<compile_context>
chip_gen: v6e
topology: v6e:2x2x1
jax: 0.10.0
libtpu: 0.0.40
codegen_flags: <defaults>
</compile_context>

<pallas_src>
import numpy as np
import jax
import jax.numpy as jnp
from jax.experimental import pallas as pl
from jax.experimental.pallas import tpu as pltpu  # noqa: F401  (kept for TPU backend)

# ----------------------------- configuration ---------------------------------
D_MODEL = 32          # d_model
NHEAD = 4             # nhead
HEAD_DIM = D_MODEL // NHEAD
DIM_FF = 64           # dim_feedforward (small for the demo)
B = 2                 # batch
PQ = 8                # number of query positions
PK = 16               # number of key positions
POS_DIM = 3           # query_pos / key_pos channels ("3/6" in the docstring)
POS_PAD = 8           # pos channels zero-padded to 8 for an aligned contraction
LN_EPS = 1e-5
BN_EPS = 1e-5
SCALE = 1.0 / float(np.sqrt(HEAD_DIM))

# W_main column layout (all sub-matrices have 32 rows, pre-transposed for x @ W)
SA_IN = 0             # 0:96    self-attn in_proj  [wq(scaled) | wk | wv]
SA_OUT = 96           # 96:128  self-attn out_proj
CA_IN = 128           # 128:224 cross-attn in_proj [wq(scaled) | wk | wv]
CA_OUT = 224          # 224:256 cross-attn out_proj
LIN1 = 256            # 256:320 linear1 (C -> FF)
LIN2 = 320            # 320:384 linear2 weight stored as (C, FF); contracted on dim 1
PW2_SELF = 384        # 384:416 self  pos-embed conv2
PW2_CROSS = 416       # 416:448 cross pos-embed conv2
W_COLS = 448

# B_all row layout (each row zero-padded to width 96)
B_SA_IN, B_CA_IN, B_LIN1 = 0, 1, 2
B_SA_OUT, B_CA_OUT, B_LIN2 = 3, 4, 5
B_N1G, B_N1B, B_N2G, B_N2B, B_N3G, B_N3B = 6, 7, 8, 9, 10, 11
B_PE1_SELF, B_PE2_SELF, B_PE1_CROSS, B_PE2_CROSS = 12, 13, 14, 15


# ----------------------------- in-kernel helpers ------------------------------
def _layer_norm(x, g, b):
    mu = jnp.mean(x, axis=-1, keepdims=True)
    var = jnp.mean(jnp.square(x - mu), axis=-1, keepdims=True)
    return (x - mu) * jax.lax.rsqrt(var + LN_EPS) * g + b


def _mha_core(qp, kp, vp, lq):
    """Per-batch multi-head attention core.

    qp: (Lq, C) projected queries (1/sqrt(head_dim) already folded into weights),
    kp, vp: (Lk, C).  Returns concatenated head outputs (Lq, C)."""
    # Logits for all heads stacked along sublanes -> one softmax pass.
    logit_blocks = []
    for h in range(NHEAD):
        s = h * HEAD_DIM
        logit_blocks.append(jax.lax.dot_general(
            qp[:, s:s + HEAD_DIM], kp[:, s:s + HEAD_DIM],
            (((1,), (1,)), ((), ())), preferred_element_type=jnp.float32))
    logits = jnp.concatenate(logit_blocks, axis=0)                  # (NHEAD*Lq, Lk)
    logits = logits - jnp.max(logits, axis=-1, keepdims=True)
    p = jnp.exp(logits)
    p = p * pl.reciprocal(jnp.sum(p, axis=-1, keepdims=True), approx=True)
    # Per-head P@V, concatenated along lanes -> (Lq, C) ready for one out-proj matmul.
    head_outs = []
    for h in range(NHEAD):
        s = h * HEAD_DIM
        head_outs.append(jnp.dot(p[h * lq:(h + 1) * lq, :], vp[:, s:s + HEAD_DIM],
                                 preferred_element_type=jnp.float32))
    return jnp.concatenate(head_outs, axis=1)                       # (Lq, C)


def decoder_layer_kernel(q_ref, k_ref, qpos_ref, kpos_ref,
                         w_ref, wp_ref, b_ref, out_ref):
    C = D_MODEL

    def bias(row, width=C):
        return b_ref[row:row + 1, 0:width]

    q = q_ref[...]                      # (B*PQ, C)
    k = k_ref[...]                      # (B*PK, C)

    # --- learned position embeddings (conv1d k=1 -> BN(eval, folded) -> relu -> conv1d) ---
    hq = jnp.maximum(
        jnp.dot(qpos_ref[...], wp_ref[:, 0:C], preferred_element_type=jnp.float32)
        + bias(B_PE1_SELF), 0.0)
    qpe = jnp.dot(hq, w_ref[:, PW2_SELF:PW2_SELF + C],
                  preferred_element_type=jnp.float32) + bias(B_PE2_SELF)      # (B*PQ, C)
    hk = jnp.maximum(
        jnp.dot(kpos_ref[...], wp_ref[:, C:2 * C], preferred_element_type=jnp.float32)
        + bias(B_PE1_CROSS), 0.0)
    kpe = jnp.dot(hk, w_ref[:, PW2_CROSS:PW2_CROSS + C],
                  preferred_element_type=jnp.float32) + bias(B_PE2_CROSS)     # (B*PK, C)

    # --- self attention + residual + norm1 (dropout1 = identity) ---
    qv = q + qpe
    sa_qkv = jnp.dot(qv, w_ref[:, SA_IN:SA_IN + 3 * C],
                     preferred_element_type=jnp.float32) + b_ref[B_SA_IN:B_SA_IN + 1, 0:3 * C]
    blocks = []
    for bb in range(B):
        r0 = bb * PQ
        blocks.append(_mha_core(sa_qkv[r0:r0 + PQ, 0:C],
                                sa_qkv[r0:r0 + PQ, C:2 * C],
                                sa_qkv[r0:r0 + PQ, 2 * C:3 * C], PQ))
    sa_attn = jnp.concatenate(blocks, axis=0)                                 # (B*PQ, C)
    sa = jnp.dot(sa_attn, w_ref[:, SA_OUT:SA_OUT + C],
                 preferred_element_type=jnp.float32) + bias(B_SA_OUT)
    x = _layer_norm(q + sa, bias(B_N1G), bias(B_N1B))

    # --- cross attention + residual + norm2 (dropout2 = identity) ---
    ca_q = jnp.dot(x + qpe, w_ref[:, CA_IN:CA_IN + C],
                   preferred_element_type=jnp.float32) + b_ref[B_CA_IN:B_CA_IN + 1, 0:C]
    kv = k + kpe
    ca_kv = jnp.dot(kv, w_ref[:, CA_IN + C:CA_IN + 3 * C],
                    preferred_element_type=jnp.float32) + b_ref[B_CA_IN:B_CA_IN + 1, C:3 * C]
    blocks = []
    for bb in range(B):
        r0q, r0k = bb * PQ, bb * PK
        blocks.append(_mha_core(ca_q[r0q:r0q + PQ, :],
                                ca_kv[r0k:r0k + PK, 0:C],
                                ca_kv[r0k:r0k + PK, C:2 * C], PQ))
    ca_attn = jnp.concatenate(blocks, axis=0)                                 # (B*PQ, C)
    ca = jnp.dot(ca_attn, w_ref[:, CA_OUT:CA_OUT + C],
                 preferred_element_type=jnp.float32) + bias(B_CA_OUT)
    x = _layer_norm(x + ca, bias(B_N2G), bias(B_N2B))

    # --- FFN: linear1 -> relu -> linear2, residual + norm3 (dropouts identity) ---
    h = jnp.maximum(
        jnp.dot(x, w_ref[:, LIN1:LIN1 + DIM_FF], preferred_element_type=jnp.float32)
        + bias(B_LIN1, DIM_FF), 0.0)
    ff = jax.lax.dot_general(h, w_ref[:, LIN2:LIN2 + DIM_FF],
                             (((1,), (1,)), ((), ())),
                             preferred_element_type=jnp.float32) + bias(B_LIN2)
    x = _layer_norm(x + ff, bias(B_N3G), bias(B_N3B))

    out_ref[...] = x.astype(out_ref.dtype)


# ----------------------------- parameters (deterministic) --------------------
def init_params(key):
    ks = iter(jax.random.split(key, 40))

    def nrm(shape, scale=0.05):
        return scale * jax.random.normal(next(ks), shape, jnp.float32)

    def pe_params():
        # PositionEmbeddingLearned: Conv1d(3->C,k=1) -> BN1d -> ReLU -> Conv1d(C->C,k=1)
        return dict(w1=nrm((D_MODEL, POS_DIM)), b1=nrm((D_MODEL,)),
                    bn_g=jnp.ones((D_MODEL,), jnp.float32),
                    bn_b=jnp.zeros((D_MODEL,), jnp.float32),
                    w2=nrm((D_MODEL, D_MODEL)), b2=nrm((D_MODEL,)))

    return dict(
        sa_in_w=nrm((3 * D_MODEL, D_MODEL)), sa_in_b=nrm((3 * D_MODEL,)),
        sa_out_w=nrm((D_MODEL, D_MODEL)), sa_out_b=nrm((D_MODEL,)),
        ca_in_w=nrm((3 * D_MODEL, D_MODEL)), ca_in_b=nrm((3 * D_MODEL,)),
        ca_out_w=nrm((D_MODEL, D_MODEL)), ca_out_b=nrm((D_MODEL,)),
        lin1_w=nrm((DIM_FF, D_MODEL)), lin1_b=nrm((DIM_FF,)),
        lin2_w=nrm((D_MODEL, DIM_FF)), lin2_b=nrm((D_MODEL,)),
        n1_g=jnp.ones((D_MODEL,), jnp.float32), n1_b=jnp.zeros((D_MODEL,), jnp.float32),
        n2_g=jnp.ones((D_MODEL,), jnp.float32), n2_b=jnp.zeros((D_MODEL,), jnp.float32),
        n3_g=jnp.ones((D_MODEL,), jnp.float32), n3_b=jnp.zeros((D_MODEL,), jnp.float32),
        self_pe=pe_params(), cross_pe=pe_params(),
    )


def pack_params(P):
    """One-time host-side packing: pre-transpose, fold 1/sqrt(dh) and eval-mode BN,
    and concatenate everything into 3 arrays for the kernel."""
    C = D_MODEL

    def fold_in_proj(in_w, in_b):
        w = in_w.T                                   # (C, 3C), y = x @ w + b
        w = w.at[:, :C].multiply(SCALE)              # fold 1/sqrt(head_dim) into wq
        b = in_b.at[:C].multiply(SCALE)
        return w, b

    sa_in_w, sa_in_b = fold_in_proj(P["sa_in_w"], P["sa_in_b"])
    ca_in_w, ca_in_b = fold_in_proj(P["ca_in_w"], P["ca_in_b"])

    def fold_pe(pe):
        # eval-mode BN with running_mean=0, running_var=1 folded into conv1
        g = pe["bn_g"] / np.sqrt(1.0 + BN_EPS)
        w1 = (pe["w1"] * g[:, None]).T               # (POS_DIM, C)
        b1 = pe["b1"] * g + pe["bn_b"]
        w1 = jnp.pad(w1, ((0, POS_PAD - POS_DIM), (0, 0)))   # zero-pad K to 8
        return w1, b1, pe["w2"].T, pe["b2"]

    spw1, spb1, spw2, spb2 = fold_pe(P["self_pe"])
    cpw1, cpb1, cpw2, cpb2 = fold_pe(P["cross_pe"])

    W_main = jnp.concatenate([
        sa_in_w,            # 0:96
        P["sa_out_w"].T,    # 96:128
        ca_in_w,            # 128:224
        P["ca_out_w"].T,    # 224:256
        P["lin1_w"].T,      # 256:320
        P["lin2_w"],        # 320:384  (kernel contracts over its dim 1)
        spw2,               # 384:416
        cpw2,               # 416:448
    ], axis=1).astype(jnp.float32)                   # (32, 448)

    W_pos1 = jnp.concatenate([spw1, cpw1], axis=1).astype(jnp.float32)   # (8, 64)

    def row(v, width=3 * C):
        v = jnp.asarray(v, jnp.float32).reshape(-1)
        return jnp.pad(v, (0, width - v.shape[0])).reshape(1, width)

    B_all = jnp.concatenate([
        row(sa_in_b), row(ca_in_b), row(P["lin1_b"]),
        row(P["sa_out_b"]), row(P["ca_out_b"]), row(P["lin2_b"]),
        row(P["n1_g"]), row(P["n1_b"]), row(P["n2_g"]), row(P["n2_b"]),
        row(P["n3_g"]), row(P["n3_b"]),
        row(spb1), row(spb2), row(cpb1), row(cpb2),
    ], axis=0).astype(jnp.float32)                   # (16, 96)

    return dict(W_main=W_main, W_pos1=W_pos1, B_all=B_all)


# ----------------------------- wrapper ---------------------------------------
def _forward(query, key, query_pos, key_pos, packed):
    """query: (B, C, Pq), key: (B, C, Pk) (PyTorch layout).  Returns (B, C, Pq)."""
    q2d = jnp.transpose(query, (0, 2, 1)).reshape(B * PQ, D_MODEL).astype(jnp.float32)
    k2d = jnp.transpose(key, (0, 2, 1)).reshape(B * PK, D_MODEL).astype(jnp.float32)
    qp2d = jnp.pad(query_pos.astype(jnp.float32).reshape(B * PQ, POS_DIM),
                   ((0, 0), (0, POS_PAD - POS_DIM)))
    kp2d = jnp.pad(key_pos.astype(jnp.float32).reshape(B * PK, POS_DIM),
                   ((0, 0), (0, POS_PAD - POS_DIM)))

    # Single grid-less invocation: every array is one whole-block VMEM resident
    # (total footprint ~100 KiB, trivially within VMEM on v5e/v6e/v7x).
    out = pl.pallas_call(
        decoder_layer_kernel,
        out_shape=jax.ShapeDtypeStruct((B * PQ, D_MODEL), jnp.float32),
    )(q2d, k2d, qp2d, kp2d, packed["W_main"], packed["W_pos1"], packed["B_all"])

    return jnp.transpose(out.reshape(B, PQ, D_MODEL), (0, 2, 1))   # (B, C, Pq)


transformer_decoder_layer = jax.jit(_forward)


# ----------------------------- pure-JAX reference -----------------------------
def pos_embed_ref(pos, pe):
    # Conv1d(k=1) == matmul; BatchNorm1d in eval mode (running_mean=0, running_var=1).
    x = pos @ pe["w1"].T + pe["b1"]
    x = (x / np.sqrt(1.0 + BN_EPS)) * pe["bn_g"] + pe["bn_b"]
    x = jnp.maximum(x, 0.0)
    x = x @ pe["w2"].T + pe["b2"]
    return x  # (B, P, C)


def _ref_mha(q_in, k_in, v_in, in_w, in_b, out_w, out_b):
    C = D_MODEL
    qp = q_in @ in_w[:C].T + in_b[:C]
    kp = k_in @ in_w[C:2 * C].T + in_b[C:2 * C]
    vp = v_in @ in_w[2 * C:].T + in_b[2 * C:]
    qh = qp.reshape(-1, NHEAD, HEAD_DIM) * SCALE
    kh = kp.reshape(-1, NHEAD, HEAD_DIM)
    vh = vp.reshape(-1, NHEAD, HEAD_DIM)
    logits = jnp.einsum('qhd,khd->hqk', qh, kh)
    p = jax.nn.softmax(logits, axis=-1)
    o = jnp.einsum('hqk,khd->qhd', p, vh).reshape(-1, C)
    return o @ out_w.T + out_b


def _ref_ln(x, g, b):
    mu = jnp.mean(x, -1, keepdims=True)
    var = jnp.mean((x - mu) ** 2, -1, keepdims=True)
    return (x - mu) / jnp.sqrt(var + LN_EPS) * g + b


def reference_forward(query, key, query_pos, key_pos, P):
    qpe = pos_embed_ref(query_pos, P["self_pe"])
    kpe = pos_embed_ref(key_pos, P["cross_pe"])
    q = jnp.transpose(query, (0, 2, 1))
    k = jnp.transpose(key, (0, 2, 1))

    def per_batch(qb, kb, qpeb, kpeb):
        qv = qb + qpeb
        sa = _ref_mha(qv, qv, qv, P["sa_in_w"], P["sa_in_b"],
                      P["sa_out_w"], P["sa_out_b"])
        x = _ref_ln(qb + sa, P["n1_g"], P["n1_b"])
        kv = kb + kpeb
        ca = _ref_mha(x + qpeb, kv, kv, P["ca_in_w"], P["ca_in_b"],
                      P["ca_out_w"], P["ca_out_b"])
        x = _ref_ln(x + ca, P["n2_g"], P["n2_b"])
        h = jnp.maximum(x @ P["lin1_w"].T + P["lin1_b"], 0.0)
        ff = h @ P["lin2_w"].T + P["lin2_b"]
        return _ref_ln(x + ff, P["n3_g"], P["n3_b"])

    out = jax.vmap(per_batch)(q, k, qpe, kpe)
    return jnp.transpose(out, (0, 2, 1))


# ----------------------------- main -------------------------------------------
if __name__ == "__main__":
    root = jax.random.PRNGKey(0)
    k_param, k_q, k_k, k_qp, k_kp = jax.random.split(root, 5)
    P = init_params(k_param)
    packed = pack_params(P)      # one-time weight packing (not per call)

    query = jax.random.normal(k_q, (B, D_MODEL, PQ), jnp.float32)
    key = jax.random.normal(k_k, (B, D_MODEL, PK), jnp.float32)
    query_pos = jax.random.normal(k_qp, (B, PQ, POS_DIM), jnp.float32)
    key_pos = jax.random.normal(k_kp, (B, PK, POS_DIM), jnp.float32)

    out = transformer_decoder_layer(query, key, query_pos, key_pos, packed)
    out = jax.block_until_ready(out)
    assert out.shape == (B, D_MODEL, PQ)

    ref = jax.block_until_ready(reference_forward(query, key, query_pos, key_pos, P))
    np.testing.assert_allclose(np.asarray(out), np.asarray(ref), rtol=2e-2, atol=2e-2)

    print("KERNEL_OK")
</pallas_src>

<mosaic_0001>
module attributes {stable_mosaic.version = 11 : i64} {
  func.func @decoder_layer_kernel(%arg0: memref<16x32xf32, #tpu.memory_space<vmem>>, %arg1: memref<32x32xf32, #tpu.memory_space<vmem>>, %arg2: memref<16x8xf32, #tpu.memory_space<vmem>>, %arg3: memref<32x8xf32, #tpu.memory_space<vmem>>, %arg4: memref<32x448xf32, #tpu.memory_space<vmem>>, %arg5: memref<8x64xf32, #tpu.memory_space<vmem>>, %arg6: memref<16x96xf32, #tpu.memory_space<vmem>>, %arg7: memref<16x32xf32, #tpu.memory_space<vmem>>) attributes {dimension_semantics = [], scalar_prefetch = 0 : i64, scratch_operands = 0 : i64, tpu.core_type = #tpu.core_type<tc>} {
    %c0 = arith.constant 0 : index
    %c0_0 = arith.constant 0 : index
    %0 = vector.load %arg0[%c0, %c0_0] : memref<16x32xf32, #tpu.memory_space<vmem>>, vector<16x32xf32>
    %c0_1 = arith.constant 0 : index
    %c0_2 = arith.constant 0 : index
    %1 = vector.load %arg1[%c0_1, %c0_2] : memref<32x32xf32, #tpu.memory_space<vmem>>, vector<32x32xf32>
    %c0_3 = arith.constant 0 : index
    %c0_4 = arith.constant 0 : index
    %2 = vector.load %arg2[%c0_3, %c0_4] : memref<16x8xf32, #tpu.memory_space<vmem>>, vector<16x8xf32>
    %c0_5 = arith.constant 0 : index
    %c0_6 = arith.constant 0 : index
    %3 = vector.load %arg5[%c0_5, %c0_6] : memref<8x64xf32, #tpu.memory_space<vmem>>, vector<8x32xf32>
    %cst = arith.constant dense<0.000000e+00> : vector<16x32xf32>
    %4 = tpu.matmul %2, %3, %cst {dimension_numbers = #tpu.dot_dimension_numbers<[1], [0], [0], [1], [0, 0, 1, 1], [], []>} : vector<16x8xf32>, vector<8x32xf32>, vector<16x32xf32> -> vector<16x32xf32>
    %c12 = arith.constant 12 : index
    %c0_7 = arith.constant 0 : index
    %5 = vector.load %arg6[%c12, %c0_7] : memref<16x96xf32, #tpu.memory_space<vmem>>, vector<1x32xf32>
    %6 = vector.broadcast %5 : vector<1x32xf32> to vector<16x32xf32>
    %7 = arith.addf %4, %6 : vector<16x32xf32>
    %cst_8 = arith.constant 0.000000e+00 : f32
    %8 = vector.broadcast %cst_8 : f32 to vector<16x32xf32>
    %9 = arith.maximumf %7, %8 : vector<16x32xf32>
    %c0_9 = arith.constant 0 : index
    %c384 = arith.constant 384 : index
    %10 = vector.load %arg4[%c0_9, %c384] : memref<32x448xf32, #tpu.memory_space<vmem>>, vector<32x32xf32>
    %cst_10 = arith.constant dense<0.000000e+00> : vector<16x32xf32>
    %11 = tpu.matmul %9, %10, %cst_10 {dimension_numbers = #tpu.dot_dimension_numbers<[1], [0], [0], [1], [0, 0, 1, 1], [], []>} : vector<16x32xf32>, vector<32x32xf32>, vector<16x32xf32> -> vector<16x32xf32>
    %c13 = arith.constant 13 : index
    %c0_11 = arith.constant 0 : index
    %12 = vector.load %arg6[%c13, %c0_11] : memref<16x96xf32, #tpu.memory_space<vmem>>, vector<1x32xf32>
    %13 = vector.broadcast %12 : vector<1x32xf32> to vector<16x32xf32>
    %14 = arith.addf %11, %13 : vector<16x32xf32>
    %c0_12 = arith.constant 0 : index
    %c0_13 = arith.constant 0 : index
    %15 = vector.load %arg3[%c0_12, %c0_13] : memref<32x8xf32, #tpu.memory_space<vmem>>, vector<32x8xf32>
    %c0_14 = arith.constant 0 : index
    %c32 = arith.constant 32 : index
    %16 = vector.load %arg5[%c0_14, %c32] : memref<8x64xf32, #tpu.memory_space<vmem>>, vector<8x32xf32>
    %cst_15 = arith.constant dense<0.000000e+00> : vector<32x32xf32>
    %17 = tpu.matmul %15, %16, %cst_15 {dimension_numbers = #tpu.dot_dimension_numbers<[1], [0], [0], [1], [0, 0, 1, 1], [], []>} : vector<32x8xf32>, vector<8x32xf32>, vector<32x32xf32> -> vector<32x32xf32>
    %c14 = arith.constant 14 : index
    %c0_16 = arith.constant 0 : index
    %18 = vector.load %arg6[%c14, %c0_16] : memref<16x96xf32, #tpu.memory_space<vmem>>, vector<1x32xf32>
    %19 = vector.broadcast %18 : vector<1x32xf32> to vector<32x32xf32>
    %20 = arith.addf %17, %19 : vector<32x32xf32>
    %cst_17 = arith.constant 0.000000e+00 : f32
    %21 = vector.broadcast %cst_17 : f32 to vector<32x32xf32>
    %22 = arith.maximumf %20, %21 : vector<32x32xf32>
    %c0_18 = arith.constant 0 : index
    %c416 = arith.constant 416 : index
    %23 = vector.load %arg4[%c0_18, %c416] : memref<32x448xf32, #tpu.memory_space<vmem>>, vector<32x32xf32>
    %cst_19 = arith.constant dense<0.000000e+00> : vector<32x32xf32>
    %24 = tpu.matmul %22, %23, %cst_19 {dimension_numbers = #tpu.dot_dimension_numbers<[1], [0], [0], [1], [0, 0, 1, 1], [], []>} : vector<32x32xf32>, vector<32x32xf32>, vector<32x32xf32> -> vector<32x32xf32>
    %c15 = arith.constant 15 : index
    %c0_20 = arith.constant 0 : index
    %25 = vector.load %arg6[%c15, %c0_20] : memref<16x96xf32, #tpu.memory_space<vmem>>, vector<1x32xf32>
    %26 = vector.broadcast %25 : vector<1x32xf32> to vector<32x32xf32>
    %27 = arith.addf %24, %26 : vector<32x32xf32>
    %28 = arith.addf %0, %14 : vector<16x32xf32>
    %c0_21 = arith.constant 0 : index
    %c0_22 = arith.constant 0 : index
    %29 = vector.load %arg4[%c0_21, %c0_22] : memref<32x448xf32, #tpu.memory_space<vmem>>, vector<32x96xf32>
    %cst_23 = arith.constant dense<0.000000e+00> : vector<16x96xf32>
    %30 = tpu.matmul %28, %29, %cst_23 {dimension_numbers = #tpu.dot_dimension_numbers<[1], [0], [0], [1], [0, 0, 1, 1], [], []>} : vector<16x32xf32>, vector<32x96xf32>, vector<16x96xf32> -> vector<16x96xf32>
    %c0_24 = arith.constant 0 : index
    %c0_25 = arith.constant 0 : index
    %31 = vector.load %arg6[%c0_24, %c0_25] : memref<16x96xf32, #tpu.memory_space<vmem>>, vector<1x96xf32>
    %32 = vector.broadcast %31 : vector<1x96xf32> to vector<16x96xf32>
    %33 = arith.addf %30, %32 : vector<16x96xf32>
    %34 = vector.extract_strided_slice %33 {offsets = [0, 0], sizes = [8, 32], strides = [1, 1]} : vector<16x96xf32> to vector<8x32xf32>
    %35 = vector.extract_strided_slice %33 {offsets = [0, 32], sizes = [8, 32], strides = [1, 1]} : vector<16x96xf32> to vector<8x32xf32>
    %36 = vector.extract_strided_slice %33 {offsets = [0, 64], sizes = [8, 32], strides = [1, 1]} : vector<16x96xf32> to vector<8x32xf32>
    %37 = vector.extract_strided_slice %34 {offsets = [0, 0], sizes = [8, 8], strides = [1, 1]} : vector<8x32xf32> to vector<8x8xf32>
    %38 = vector.extract_strided_slice %35 {offsets = [0, 0], sizes = [8, 8], strides = [1, 1]} : vector<8x32xf32> to vector<8x8xf32>
    %cst_26 = arith.constant dense<0.000000e+00> : vector<8x8xf32>
    %39 = tpu.matmul %37, %38, %cst_26 {dimension_numbers = #tpu.dot_dimension_numbers<[1], [1], [0], [0], [0, 0, 1, 0], [], []>} : vector<8x8xf32>, vector<8x8xf32>, vector<8x8xf32> -> vector<8x8xf32>
    %40 = vector.extract_strided_slice %34 {offsets = [0, 8], sizes = [8, 8], strides = [1, 1]} : vector<8x32xf32> to vector<8x8xf32>
    %41 = vector.extract_strided_slice %35 {offsets = [0, 8], sizes = [8, 8], strides = [1, 1]} : vector<8x32xf32> to vector<8x8xf32>
    %cst_27 = arith.constant dense<0.000000e+00> : vector<8x8xf32>
    %42 = tpu.matmul %40, %41, %cst_27 {dimension_numbers = #tpu.dot_dimension_numbers<[1], [1], [0], [0], [0, 0, 1, 0], [], []>} : vector<8x8xf32>, vector<8x8xf32>, vector<8x8xf32> -> vector<8x8xf32>
    %43 = vector.extract_strided_slice %34 {offsets = [0, 16], sizes = [8, 8], strides = [1, 1]} : vector<8x32xf32> to vector<8x8xf32>
    %44 = vector.extract_strided_slice %35 {offsets = [0, 16], sizes = [8, 8], strides = [1, 1]} : vector<8x32xf32> to vector<8x8xf32>
    %cst_28 = arith.constant dense<0.000000e+00> : vector<8x8xf32>
    %45 = tpu.matmul %43, %44, %cst_28 {dimension_numbers = #tpu.dot_dimension_numbers<[1], [1], [0], [0], [0, 0, 1, 0], [], []>} : vector<8x8xf32>, vector<8x8xf32>, vector<8x8xf32> -> vector<8x8xf32>
    %46 = vector.extract_strided_slice %34 {offsets = [0, 24], sizes = [8, 8], strides = [1, 1]} : vector<8x32xf32> to vector<8x8xf32>
    %47 = vector.extract_strided_slice %35 {offsets = [0, 24], sizes = [8, 8], strides = [1, 1]} : vector<8x32xf32> to vector<8x8xf32>
    %cst_29 = arith.constant dense<0.000000e+00> : vector<8x8xf32>
    %48 = tpu.matmul %46, %47, %cst_29 {dimension_numbers = #tpu.dot_dimension_numbers<[1], [1], [0], [0], [0, 0, 1, 0], [], []>} : vector<8x8xf32>, vector<8x8xf32>, vector<8x8xf32> -> vector<8x8xf32>
    %49 = tpu.concatenate %39, %42, %45, %48 in 0 : vector<8x8xf32>, vector<8x8xf32>, vector<8x8xf32>, vector<8x8xf32> -> vector<32x8xf32>
    %cst_30 = arith.constant dense<0xFF800000> : vector<32xf32>
    %50 = vector.multi_reduction <maximumf>, %49, %cst_30 [1] : vector<32x8xf32> to vector<32xf32>
    %51 = vector.shape_cast %50 : vector<32xf32> to vector<32x1xf32>
    %52 = vector.broadcast %51 : vector<32x1xf32> to vector<32x8xf32>
    %53 = arith.subf %49, %52 : vector<32x8xf32>
    %54 = math.exp %53 : vector<32x8xf32>
    %cst_31 = arith.constant dense<0.000000e+00> : vector<32xf32>
    %55 = vector.multi_reduction <add>, %54, %cst_31 [1] : vector<32x8xf32> to vector<32xf32>
    %56 = vector.shape_cast %55 : vector<32xf32> to vector<32x1xf32>
    %57 = tpu.reciprocal %56 {approx = true} : vector<32x1xf32> -> vector<32x1xf32>
    %58 = vector.broadcast %57 : vector<32x1xf32> to vector<32x8xf32>
    %59 = arith.mulf %54, %58 : vector<32x8xf32>
    %60 = vector.extract_strided_slice %59 {offsets = [0, 0], sizes = [8, 8], strides = [1, 1]} : vector<32x8xf32> to vector<8x8xf32>
    %61 = vector.extract_strided_slice %36 {offsets = [0, 0], sizes = [8, 8], strides = [1, 1]} : vector<8x32xf32> to vector<8x8xf32>
    %cst_32 = arith.constant dense<0.000000e+00> : vector<8x8xf32>
    %62 = tpu.matmul %60, %61, %cst_32 {dimension_numbers = #tpu.dot_dimension_numbers<[1], [0], [0], [1], [0, 0, 1, 1], [], []>} : vector<8x8xf32>, vector<8x8xf32>, vector<8x8xf32> -> vector<8x8xf32>
    %63 = vector.extract_strided_slice %59 {offsets = [8, 0], sizes = [8, 8], strides = [1, 1]} : vector<32x8xf32> to vector<8x8xf32>
    %64 = vector.extract_strided_slice %36 {offsets = [0, 8], sizes = [8, 8], strides = [1, 1]} : vector<8x32xf32> to vector<8x8xf32>
    %cst_33 = arith.constant dense<0.000000e+00> : vector<8x8xf32>
    %65 = tpu.matmul %63, %64, %cst_33 {dimension_numbers = #tpu.dot_dimension_numbers<[1], [0], [0], [1], [0, 0, 1, 1], [], []>} : vector<8x8xf32>, vector<8x8xf32>, vector<8x8xf32> -> vector<8x8xf32>
    %66 = vector.extract_strided_slice %59 {offsets = [16, 0], sizes = [8, 8], strides = [1, 1]} : vector<32x8xf32> to vector<8x8xf32>
    %67 = vector.extract_strided_slice %36 {offsets = [0, 16], sizes = [8, 8], strides = [1, 1]} : vector<8x32xf32> to vector<8x8xf32>
    %cst_34 = arith.constant dense<0.000000e+00> : vector<8x8xf32>
    %68 = tpu.matmul %66, %67, %cst_34 {dimension_numbers = #tpu.dot_dimension_numbers<[1], [0], [0], [1], [0, 0, 1, 1], [], []>} : vector<8x8xf32>, vector<8x8xf32>, vector<8x8xf32> -> vector<8x8xf32>
    %69 = vector.extract_strided_slice %59 {offsets = [24, 0], sizes = [8, 8], strides = [1, 1]} : vector<32x8xf32> to vector<8x8xf32>
    %70 = vector.extract_strided_slice %36 {offsets = [0, 24], sizes = [8, 8], strides = [1, 1]} : vector<8x32xf32> to vector<8x8xf32>
    %cst_35 = arith.constant dense<0.000000e+00> : vector<8x8xf32>
    %71 = tpu.matmul %69, %70, %cst_35 {dimension_numbers = #tpu.dot_dimension_numbers<[1], [0], [0], [1], [0, 0, 1, 1], [], []>} : vector<8x8xf32>, vector<8x8xf32>, vector<8x8xf32> -> vector<8x8xf32>
    %72 = tpu.concatenate %62, %65, %68, %71 in 1 : vector<8x8xf32>, vector<8x8xf32>, vector<8x8xf32>, vector<8x8xf32> -> vector<8x32xf32>
    %73 = vector.extract_strided_slice %33 {offsets = [8, 0], sizes = [8, 32], strides = [1, 1]} : vector<16x96xf32> to vector<8x32xf32>
    %74 = vector.extract_strided_slice %33 {offsets = [8, 32], sizes = [8, 32], strides = [1, 1]} : vector<16x96xf32> to vector<8x32xf32>
    %75 = vector.extract_strided_slice %33 {offsets = [8, 64], sizes = [8, 32], strides = [1, 1]} : vector<16x96xf32> to vector<8x32xf32>
    %76 = vector.extract_strided_slice %73 {offsets = [0, 0], sizes = [8, 8], strides = [1, 1]} : vector<8x32xf32> to vector<8x8xf32>
    %77 = vector.extract_strided_slice %74 {offsets = [0, 0], sizes = [8, 8], strides = [1, 1]} : vector<8x32xf32> to vector<8x8xf32>
    %cst_36 = arith.constant dense<0.000000e+00> : vector<8x8xf32>
    %78 = tpu.matmul %76, %77, %cst_36 {dimension_numbers = #tpu.dot_dimension_numbers<[1], [1], [0], [0], [0, 0, 1, 0], [], []>} : vector<8x8xf32>, vector<8x8xf32>, vector<8x8xf32> -> vector<8x8xf32>
    %79 = vector.extract_strided_slice %73 {offsets = [0, 8], sizes = [8, 8], strides = [1, 1]} : vector<8x32xf32> to vector<8x8xf32>
    %80 = vector.extract_strided_slice %74 {offsets = [0, 8], sizes = [8, 8], strides = [1, 1]} : vector<8x32xf32> to vector<8x8xf32>
    %cst_37 = arith.constant dense<0.000000e+00> : vector<8x8xf32>
    %81 = tpu.matmul %79, %80, %cst_37 {dimension_numbers = #tpu.dot_dimension_numbers<[1], [1], [0], [0], [0, 0, 1, 0], [], []>} : vector<8x8xf32>, vector<8x8xf32>, vector<8x8xf32> -> vector<8x8xf32>
    %82 = vector.extract_strided_slice %73 {offsets = [0, 16], sizes = [8, 8], strides = [1, 1]} : vector<8x32xf32> to vector<8x8xf32>
    %83 = vector.extract_strided_slice %74 {offsets = [0, 16], sizes = [8, 8], strides = [1, 1]} : vector<8x32xf32> to vector<8x8xf32>
    %cst_38 = arith.constant dense<0.000000e+00> : vector<8x8xf32>
    %84 = tpu.matmul %82, %83, %cst_38 {dimension_numbers = #tpu.dot_dimension_numbers<[1], [1], [0], [0], [0, 0, 1, 0], [], []>} : vector<8x8xf32>, vector<8x8xf32>, vector<8x8xf32> -> vector<8x8xf32>
    %85 = vector.extract_strided_slice %73 {offsets = [0, 24], sizes = [8, 8], strides = [1, 1]} : vector<8x32xf32> to vector<8x8xf32>
    %86 = vector.extract_strided_slice %74 {offsets = [0, 24], sizes = [8, 8], strides = [1, 1]} : vector<8x32xf32> to vector<8x8xf32>
    %cst_39 = arith.constant dense<0.000000e+00> : vector<8x8xf32>
    %87 = tpu.matmul %85, %86, %cst_39 {dimension_numbers = #tpu.dot_dimension_numbers<[1], [1], [0], [0], [0, 0, 1, 0], [], []>} : vector<8x8xf32>, vector<8x8xf32>, vector<8x8xf32> -> vector<8x8xf32>
    %88 = tpu.concatenate %78, %81, %84, %87 in 0 : vector<8x8xf32>, vector<8x8xf32>, vector<8x8xf32>, vector<8x8xf32> -> vector<32x8xf32>
    %cst_40 = arith.constant dense<0xFF800000> : vector<32xf32>
    %89 = vector.multi_reduction <maximumf>, %88, %cst_40 [1] : vector<32x8xf32> to vector<32xf32>
    %90 = vector.shape_cast %89 : vector<32xf32> to vector<32x1xf32>
    %91 = vector.broadcast %90 : vector<32x1xf32> to vector<32x8xf32>
    %92 = arith.subf %88, %91 : vector<32x8xf32>
    %93 = math.exp %92 : vector<32x8xf32>
    %cst_41 = arith.constant dense<0.000000e+00> : vector<32xf32>
    %94 = vector.multi_reduction <add>, %93, %cst_41 [1] : vector<32x8xf32> to vector<32xf32>
    %95 = vector.shape_cast %94 : vector<32xf32> to vector<32x1xf32>
    %96 = tpu.reciprocal %95 {approx = true} : vector<32x1xf32> -> vector<32x1xf32>
    %97 = vector.broadcast %96 : vector<32x1xf32> to vector<32x8xf32>
    %98 = arith.mulf %93, %97 : vector<32x8xf32>
    %99 = vector.extract_strided_slice %98 {offsets = [0, 0], sizes = [8, 8], strides = [1, 1]} : vector<32x8xf32> to vector<8x8xf32>
    %100 = vector.extract_strided_slice %75 {offsets = [0, 0], sizes = [8, 8], strides = [1, 1]} : vector<8x32xf32> to vector<8x8xf32>
    %cst_42 = arith.constant dense<0.000000e+00> : vector<8x8xf32>
    %101 = tpu.matmul %99, %100, %cst_42 {dimension_numbers = #tpu.dot_dimension_numbers<[1], [0], [0], [1], [0, 0, 1, 1], [], []>} : vector<8x8xf32>, vector<8x8xf32>, vector<8x8xf32> -> vector<8x8xf32>
    %102 = vector.extract_strided_slice %98 {offsets = [8, 0], sizes = [8, 8], strides = [1, 1]} : vector<32x8xf32> to vector<8x8xf32>
    %103 = vector.extract_strided_slice %75 {offsets = [0, 8], sizes = [8, 8], strides = [1, 1]} : vector<8x32xf32> to vector<8x8xf32>
    %cst_43 = arith.constant dense<0.000000e+00> : vector<8x8xf32>
    %104 = tpu.matmul %102, %103, %cst_43 {dimension_numbers = #tpu.dot_dimension_numbers<[1], [0], [0], [1], [0, 0, 1, 1], [], []>} : vector<8x8xf32>, vector<8x8xf32>, vector<8x8xf32> -> vector<8x8xf32>
    %105 = vector.extract_strided_slice %98 {offsets = [16, 0], sizes = [8, 8], strides = [1, 1]} : vector<32x8xf32> to vector<8x8xf32>
    %106 = vector.extract_strided_slice %75 {offsets = [0, 16], sizes = [8, 8], strides = [1, 1]} : vector<8x32xf32> to vector<8x8xf32>
    %cst_44 = arith.constant dense<0.000000e+00> : vector<8x8xf32>
    %107 = tpu.matmul %105, %106, %cst_44 {dimension_numbers = #tpu.dot_dimension_numbers<[1], [0], [0], [1], [0, 0, 1, 1], [], []>} : vector<8x8xf32>, vector<8x8xf32>, vector<8x8xf32> -> vector<8x8xf32>
    %108 = vector.extract_strided_slice %98 {offsets = [24, 0], sizes = [8, 8], strides = [1, 1]} : vector<32x8xf32> to vector<8x8xf32>
    %109 = vector.extract_strided_slice %75 {offsets = [0, 24], sizes = [8, 8], strides = [1, 1]} : vector<8x32xf32> to vector<8x8xf32>
    %cst_45 = arith.constant dense<0.000000e+00> : vector<8x8xf32>
    %110 = tpu.matmul %108, %109, %cst_45 {dimension_numbers = #tpu.dot_dimension_numbers<[1], [0], [0], [1], [0, 0, 1, 1], [], []>} : vector<8x8xf32>, vector<8x8xf32>, vector<8x8xf32> -> vector<8x8xf32>
    %111 = tpu.concatenate %101, %104, %107, %110 in 1 : vector<8x8xf32>, vector<8x8xf32>, vector<8x8xf32>, vector<8x8xf32> -> vector<8x32xf32>
    %112 = tpu.concatenate %72, %111 in 0 : vector<8x32xf32>, vector<8x32xf32> -> vector<16x32xf32>
    %c0_46 = arith.constant 0 : index
    %c96 = arith.constant 96 : index
    %113 = vector.load %arg4[%c0_46, %c96] : memref<32x448xf32, #tpu.memory_space<vmem>>, vector<32x32xf32>
    %cst_47 = arith.constant dense<0.000000e+00> : vector<16x32xf32>
    %114 = tpu.matmul %112, %113, %cst_47 {dimension_numbers = #tpu.dot_dimension_numbers<[1], [0], [0], [1], [0, 0, 1, 1], [], []>} : vector<16x32xf32>, vector<32x32xf32>, vector<16x32xf32> -> vector<16x32xf32>
    %c3 = arith.constant 3 : index
    %c0_48 = arith.constant 0 : index
    %115 = vector.load %arg6[%c3, %c0_48] : memref<16x96xf32, #tpu.memory_space<vmem>>, vector<1x32xf32>
    %116 = vector.broadcast %115 : vector<1x32xf32> to vector<16x32xf32>
    %117 = arith.addf %114, %116 : vector<16x32xf32>
    %118 = arith.addf %0, %117 : vector<16x32xf32>
    %c6 = arith.constant 6 : index
    %c0_49 = arith.constant 0 : index
    %119 = vector.load %arg6[%c6, %c0_49] : memref<16x96xf32, #tpu.memory_space<vmem>>, vector<1x32xf32>
    %c7 = arith.constant 7 : index
    %c0_50 = arith.constant 0 : index
    %120 = vector.load %arg6[%c7, %c0_50] : memref<16x96xf32, #tpu.memory_space<vmem>>, vector<1x32xf32>
    %cst_51 = arith.constant dense<0.000000e+00> : vector<16xf32>
    %121 = vector.multi_reduction <add>, %118, %cst_51 [1] : vector<16x32xf32> to vector<16xf32>
    %122 = vector.shape_cast %121 : vector<16xf32> to vector<16x1xf32>
    %cst_52 = arith.constant 3.200000e+01 : f32
    %123 = vector.broadcast %cst_52 : f32 to vector<16x1xf32>
    %124 = arith.divf %122, %123 : vector<16x1xf32>
    %125 = vector.broadcast %124 : vector<16x1xf32> to vector<16x32xf32>
    %126 = arith.subf %118, %125 : vector<16x32xf32>
    %127 = arith.mulf %126, %126 : vector<16x32xf32>
    %cst_53 = arith.constant dense<0.000000e+00> : vector<16xf32>
    %128 = vector.multi_reduction <add>, %127, %cst_53 [1] : vector<16x32xf32> to vector<16xf32>
    %129 = vector.shape_cast %128 : vector<16xf32> to vector<16x1xf32>
    %cst_54 = arith.constant 3.200000e+01 : f32
    %130 = vector.broadcast %cst_54 : f32 to vector<16x1xf32>
    %131 = arith.divf %129, %130 : vector<16x1xf32>
    %132 = vector.broadcast %124 : vector<16x1xf32> to vector<16x32xf32>
    %133 = arith.subf %118, %132 : vector<16x32xf32>
    %cst_55 = arith.constant 9.99999974E-6 : f32
    %134 = vector.broadcast %cst_55 : f32 to vector<16x1xf32>
    %135 = arith.addf %131, %134 : vector<16x1xf32>
    %136 = math.rsqrt %135 : vector<16x1xf32>
    %137 = vector.broadcast %136 : vector<16x1xf32> to vector<16x32xf32>
    %138 = arith.mulf %133, %137 : vector<16x32xf32>
    %139 = vector.broadcast %119 : vector<1x32xf32> to vector<16x32xf32>
    %140 = arith.mulf %138, %139 : vector<16x32xf32>
    %141 = vector.broadcast %120 : vector<1x32xf32> to vector<16x32xf32>
    %142 = arith.addf %140, %141 : vector<16x32xf32>
    %143 = arith.addf %142, %14 : vector<16x32xf32>
    %c0_56 = arith.constant 0 : index
    %c128 = arith.constant 128 : index
    %144 = vector.load %arg4[%c0_56, %c128] : memref<32x448xf32, #tpu.memory_space<vmem>>, vector<32x32xf32>
    %cst_57 = arith.constant dense<0.000000e+00> : vector<16x32xf32>
    %145 = tpu.matmul %143, %144, %cst_57 {dimension_numbers = #tpu.dot_dimension_numbers<[1], [0], [0], [1], [0, 0, 1, 1], [], []>} : vector<16x32xf32>, vector<32x32xf32>, vector<16x32xf32> -> vector<16x32xf32>
    %c1 = arith.constant 1 : index
    %c0_58 = arith.constant 0 : index
    %146 = vector.load %arg6[%c1, %c0_58] : memref<16x96xf32, #tpu.memory_space<vmem>>, vector<1x32xf32>
    %147 = vector.broadcast %146 : vector<1x32xf32> to vector<16x32xf32>
    %148 = arith.addf %145, %147 : vector<16x32xf32>
    %149 = arith.addf %1, %27 : vector<32x32xf32>
    %c0_59 = arith.constant 0 : index
    %c160 = arith.constant 160 : index
    %150 = vector.load %arg4[%c0_59, %c160] : memref<32x448xf32, #tpu.memory_space<vmem>>, vector<32x64xf32>
    %cst_60 = arith.constant dense<0.000000e+00> : vector<32x64xf32>
    %151 = tpu.matmul %149, %150, %cst_60 {dimension_numbers = #tpu.dot_dimension_numbers<[1], [0], [0], [1], [0, 0, 1, 1], [], []>} : vector<32x32xf32>, vector<32x64xf32>, vector<32x64xf32> -> vector<32x64xf32>
    %c1_61 = arith.constant 1 : index
    %c32_62 = arith.constant 32 : index
    %152 = vector.load %arg6[%c1_61, %c32_62] : memref<16x96xf32, #tpu.memory_space<vmem>>, vector<1x64xf32>
    %153 = vector.broadcast %152 : vector<1x64xf32> to vector<32x64xf32>
    %154 = arith.addf %151, %153 : vector<32x64xf32>
    %155 = vector.extract_strided_slice %148 {offsets = [0, 0], sizes = [8, 32], strides = [1, 1]} : vector<16x32xf32> to vector<8x32xf32>
    %156 = vector.extract_strided_slice %154 {offsets = [0, 0], sizes = [16, 32], strides = [1, 1]} : vector<32x64xf32> to vector<16x32xf32>
    %157 = vector.extract_strided_slice %154 {offsets = [0, 32], sizes = [16, 32], strides = [1, 1]} : vector<32x64xf32> to vector<16x32xf32>
    %158 = vector.extract_strided_slice %155 {offsets = [0, 0], sizes = [8, 8], strides = [1, 1]} : vector<8x32xf32> to vector<8x8xf32>
    %159 = vector.extract_strided_slice %156 {offsets = [0, 0], sizes = [16, 8], strides = [1, 1]} : vector<16x32xf32> to vector<16x8xf32>
    %cst_63 = arith.constant dense<0.000000e+00> : vector<8x16xf32>
    %160 = tpu.matmul %158, %159, %cst_63 {dimension_numbers = #tpu.dot_dimension_numbers<[1], [1], [0], [0], [0, 0, 1, 0], [], []>} : vector<8x8xf32>, vector<16x8xf32>, vector<8x16xf32> -> vector<8x16xf32>
    %161 = vector.extract_strided_slice %155 {offsets = [0, 8], sizes = [8, 8], strides = [1, 1]} : vector<8x32xf32> to vector<8x8xf32>
    %162 = vector.extract_strided_slice %156 {offsets = [0, 8], sizes = [16, 8], strides = [1, 1]} : vector<16x32xf32> to vector<16x8xf32>
    %cst_64 = arith.constant dense<0.000000e+00> : vector<8x16xf32>
    %163 = tpu.matmul %161, %162, %cst_64 {dimension_numbers = #tpu.dot_dimension_numbers<[1], [1], [0], [0], [0, 0, 1, 0], [], []>} : vector<8x8xf32>, vector<16x8xf32>, vector<8x16xf32> -> vector<8x16xf32>
    %164 = vector.extract_strided_slice %155 {offsets = [0, 16], sizes = [8, 8], strides = [1, 1]} : vector<8x32xf32> to vector<8x8xf32>
    %165 = vector.extract_strided_slice %156 {offsets = [0, 16], sizes = [16, 8], strides = [1, 1]} : vector<16x32xf32> to vector<16x8xf32>
    %cst_65 = arith.constant dense<0.000000e+00> : vector<8x16xf32>
    %166 = tpu.matmul %164, %165, %cst_65 {dimension_numbers = #tpu.dot_dimension_numbers<[1], [1], [0], [0], [0, 0, 1, 0], [], []>} : vector<8x8xf32>, vector<16x8xf32>, vector<8x16xf32> -> vector<8x16xf32>
    %167 = vector.extract_strided_slice %155 {offsets = [0, 24], sizes = [8, 8], strides = [1, 1]} : vector<8x32xf32> to vector<8x8xf32>
    %168 = vector.extract_strided_slice %156 {offsets = [0, 24], sizes = [16, 8], strides = [1, 1]} : vector<16x32xf32> to vector<16x8xf32>
    %cst_66 = arith.constant dense<0.000000e+00> : vector<8x16xf32>
    %169 = tpu.matmul %167, %168, %cst_66 {dimension_numbers = #tpu.dot_dimension_numbers<[1], [1], [0], [0], [0, 0, 1, 0], [], []>} : vector<8x8xf32>, vector<16x8xf32>, vector<8x16xf32> -> vector<8x16xf32>
    %170 = tpu.concatenate %160, %163, %166, %169 in 0 : vector<8x16xf32>, vector<8x16xf32>, vector<8x16xf32>, vector<8x16xf32> -> vector<32x16xf32>
    %cst_67 = arith.constant dense<0xFF800000> : vector<32xf32>
    %171 = vector.multi_reduction <maximumf>, %170, %cst_67 [1] : vector<32x16xf32> to vector<32xf32>
    %172 = vector.shape_cast %171 : vector<32xf32> to vector<32x1xf32>
    %173 = vector.broadcast %172 : vector<32x1xf32> to vector<32x16xf32>
    %174 = arith.subf %170, %173 : vector<32x16xf32>
    %175 = math.exp %174 : vector<32x16xf32>
    %cst_68 = arith.constant dense<0.000000e+00> : vector<32xf32>
    %176 = vector.multi_reduction <add>, %175, %cst_68 [1] : vector<32x16xf32> to vector<32xf32>
    %177 = vector.shape_cast %176 : vector<32xf32> to vector<32x1xf32>
    %178 = tpu.reciprocal %177 {approx = true} : vector<32x1xf32> -> vector<32x1xf32>
    %179 = vector.broadcast %178 : vector<32x1xf32> to vector<32x16xf32>
    %180 = arith.mulf %175, %179 : vector<32x16xf32>
    %181 = vector.extract_strided_slice %180 {offsets = [0, 0], sizes = [8, 16], strides = [1, 1]} : vector<32x16xf32> to vector<8x16xf32>
    %182 = vector.extract_strided_slice %157 {offsets = [0, 0], sizes = [16, 8], strides = [1, 1]} : vector<16x32xf32> to vector<16x8xf32>
    %cst_69 = arith.constant dense<0.000000e+00> : vector<8x8xf32>
    %183 = tpu.matmul %181, %182, %cst_69 {dimension_numbers = #tpu.dot_dimension_numbers<[1], [0], [0], [1], [0, 0, 1, 1], [], []>} : vector<8x16xf32>, vector<16x8xf32>, vector<8x8xf32> -> vector<8x8xf32>
    %184 = vector.extract_strided_slice %180 {offsets = [8, 0], sizes = [8, 16], strides = [1, 1]} : vector<32x16xf32> to vector<8x16xf32>
    %185 = vector.extract_strided_slice %157 {offsets = [0, 8], sizes = [16, 8], strides = [1, 1]} : vector<16x32xf32> to vector<16x8xf32>
    %cst_70 = arith.constant dense<0.000000e+00> : vector<8x8xf32>
    %186 = tpu.matmul %184, %185, %cst_70 {dimension_numbers = #tpu.dot_dimension_numbers<[1], [0], [0], [1], [0, 0, 1, 1], [], []>} : vector<8x16xf32>, vector<16x8xf32>, vector<8x8xf32> -> vector<8x8xf32>
    %187 = vector.extract_strided_slice %180 {offsets = [16, 0], sizes = [8, 16], strides = [1, 1]} : vector<32x16xf32> to vector<8x16xf32>
    %188 = vector.extract_strided_slice %157 {offsets = [0, 16], sizes = [16, 8], strides = [1, 1]} : vector<16x32xf32> to vector<16x8xf32>
    %cst_71 = arith.constant dense<0.000000e+00> : vector<8x8xf32>
    %189 = tpu.matmul %187, %188, %cst_71 {dimension_numbers = #tpu.dot_dimension_numbers<[1], [0], [0], [1], [0, 0, 1, 1], [], []>} : vector<8x16xf32>, vector<16x8xf32>, vector<8x8xf32> -> vector<8x8xf32>
    %190 = vector.extract_strided_slice %180 {offsets = [24, 0], sizes = [8, 16], strides = [1, 1]} : vector<32x16xf32> to vector<8x16xf32>
    %191 = vector.extract_strided_slice %157 {offsets = [0, 24], sizes = [16, 8], strides = [1, 1]} : vector<16x32xf32> to vector<16x8xf32>
    %cst_72 = arith.constant dense<0.000000e+00> : vector<8x8xf32>
    %192 = tpu.matmul %190, %191, %cst_72 {dimension_numbers = #tpu.dot_dimension_numbers<[1], [0], [0], [1], [0, 0, 1, 1], [], []>} : vector<8x16xf32>, vector<16x8xf32>, vector<8x8xf32> -> vector<8x8xf32>
    %193 = tpu.concatenate %183, %186, %189, %192 in 1 : vector<8x8xf32>, vector<8x8xf32>, vector<8x8xf32>, vector<8x8xf32> -> vector<8x32xf32>
    %194 = vector.extract_strided_slice %148 {offsets = [8, 0], sizes = [8, 32], strides = [1, 1]} : vector<16x32xf32> to vector<8x32xf32>
    %195 = vector.extract_strided_slice %154 {offsets = [16, 0], sizes = [16, 32], strides = [1, 1]} : vector<32x64xf32> to vector<16x32xf32>
    %196 = vector.extract_strided_slice %154 {offsets = [16, 32], sizes = [16, 32], strides = [1, 1]} : vector<32x64xf32> to vector<16x32xf32>
    %197 = vector.extract_strided_slice %194 {offsets = [0, 0], sizes = [8, 8], strides = [1, 1]} : vector<8x32xf32> to vector<8x8xf32>
    %198 = vector.extract_strided_slice %195 {offsets = [0, 0], sizes = [16, 8], strides = [1, 1]} : vector<16x32xf32> to vector<16x8xf32>
    %cst_73 = arith.constant dense<0.000000e+00> : vector<8x16xf32>
    %199 = tpu.matmul %197, %198, %cst_73 {dimension_numbers = #tpu.dot_dimension_numbers<[1], [1], [0], [0], [0, 0, 1, 0], [], []>} : vector<8x8xf32>, vector<16x8xf32>, vector<8x16xf32> -> vector<8x16xf32>
    %200 = vector.extract_strided_slice %194 {offsets = [0, 8], sizes = [8, 8], strides = [1, 1]} : vector<8x32xf32> to vector<8x8xf32>
    %201 = vector.extract_strided_slice %195 {offsets = [0, 8], sizes = [16, 8], strides = [1, 1]} : vector<16x32xf32> to vector<16x8xf32>
    %cst_74 = arith.constant dense<0.000000e+00> : vector<8x16xf32>
    %202 = tpu.matmul %200, %201, %cst_74 {dimension_numbers = #tpu.dot_dimension_numbers<[1], [1], [0], [0], [0, 0, 1, 0], [], []>} : vector<8x8xf32>, vector<16x8xf32>, vector<8x16xf32> -> vector<8x16xf32>
    %203 = vector.extract_strided_slice %194 {offsets = [0, 16], sizes = [8, 8], strides = [1, 1]} : vector<8x32xf32> to vector<8x8xf32>
    %204 = vector.extract_strided_slice %195 {offsets = [0, 16], sizes = [16, 8], strides = [1, 1]} : vector<16x32xf32> to vector<16x8xf32>
    %cst_75 = arith.constant dense<0.000000e+00> : vector<8x16xf32>
    %205 = tpu.matmul %203, %204, %cst_75 {dimension_numbers = #tpu.dot_dimension_numbers<[1], [1], [0], [0], [0, 0, 1, 0], [], []>} : vector<8x8xf32>, vector<16x8xf32>, vector<8x16xf32> -> vector<8x16xf32>
    %206 = vector.extract_strided_slice %194 {offsets = [0, 24], sizes = [8, 8], strides = [1, 1]} : vector<8x32xf32> to vector<8x8xf32>
    %207 = vector.extract_strided_slice %195 {offsets = [0, 24], sizes = [16, 8], strides = [1, 1]} : vector<16x32xf32> to vector<16x8xf32>
    %cst_76 = arith.constant dense<0.000000e+00> : vector<8x16xf32>
    %208 = tpu.matmul %206, %207, %cst_76 {dimension_numbers = #tpu.dot_dimension_numbers<[1], [1], [0], [0], [0, 0, 1, 0], [], []>} : vector<8x8xf32>, vector<16x8xf32>, vector<8x16xf32> -> vector<8x16xf32>
    %209 = tpu.concatenate %199, %202, %205, %208 in 0 : vector<8x16xf32>, vector<8x16xf32>, vector<8x16xf32>, vector<8x16xf32> -> vector<32x16xf32>
    %cst_77 = arith.constant dense<0xFF800000> : vector<32xf32>
    %210 = vector.multi_reduction <maximumf>, %209, %cst_77 [1] : vector<32x16xf32> to vector<32xf32>
    %211 = vector.shape_cast %210 : vector<32xf32> to vector<32x1xf32>
    %212 = vector.broadcast %211 : vector<32x1xf32> to vector<32x16xf32>
    %213 = arith.subf %209, %212 : vector<32x16xf32>
    %214 = math.exp %213 : vector<32x16xf32>
    %cst_78 = arith.constant dense<0.000000e+00> : vector<32xf32>
    %215 = vector.multi_reduction <add>, %214, %cst_78 [1] : vector<32x16xf32> to vector<32xf32>
    %216 = vector.shape_cast %215 : vector<32xf32> to vector<32x1xf32>
    %217 = tpu.reciprocal %216 {approx = true} : vector<32x1xf32> -> vector<32x1xf32>
    %218 = vector.broadcast %217 : vector<32x1xf32> to vector<32x16xf32>
    %219 = arith.mulf %214, %218 : vector<32x16xf32>
    %220 = vector.extract_strided_slice %219 {offsets = [0, 0], sizes = [8, 16], strides = [1, 1]} : vector<32x16xf32> to vector<8x16xf32>
    %221 = vector.extract_strided_slice %196 {offsets = [0, 0], sizes = [16, 8], strides = [1, 1]} : vector<16x32xf32> to vector<16x8xf32>
    %cst_79 = arith.constant dense<0.000000e+00> : vector<8x8xf32>
    %222 = tpu.matmul %220, %221, %cst_79 {dimension_numbers = #tpu.dot_dimension_numbers<[1], [0], [0], [1], [0, 0, 1, 1], [], []>} : vector<8x16xf32>, vector<16x8xf32>, vector<8x8xf32> -> vector<8x8xf32>
    %223 = vector.extract_strided_slice %219 {offsets = [8, 0], sizes = [8, 16], strides = [1, 1]} : vector<32x16xf32> to vector<8x16xf32>
    %224 = vector.extract_strided_slice %196 {offsets = [0, 8], sizes = [16, 8], strides = [1, 1]} : vector<16x32xf32> to vector<16x8xf32>
    %cst_80 = arith.constant dense<0.000000e+00> : vector<8x8xf32>
    %225 = tpu.matmul %223, %224, %cst_80 {dimension_numbers = #tpu.dot_dimension_numbers<[1], [0], [0], [1], [0, 0, 1, 1], [], []>} : vector<8x16xf32>, vector<16x8xf32>, vector<8x8xf32> -> vector<8x8xf32>
    %226 = vector.extract_strided_slice %219 {offsets = [16, 0], sizes = [8, 16], strides = [1, 1]} : vector<32x16xf32> to vector<8x16xf32>
    %227 = vector.extract_strided_slice %196 {offsets = [0, 16], sizes = [16, 8], strides = [1, 1]} : vector<16x32xf32> to vector<16x8xf32>
    %cst_81 = arith.constant dense<0.000000e+00> : vector<8x8xf32>
    %228 = tpu.matmul %226, %227, %cst_81 {dimension_numbers = #tpu.dot_dimension_numbers<[1], [0], [0], [1], [0, 0, 1, 1], [], []>} : vector<8x16xf32>, vector<16x8xf32>, vector<8x8xf32> -> vector<8x8xf32>
    %229 = vector.extract_strided_slice %219 {offsets = [24, 0], sizes = [8, 16], strides = [1, 1]} : vector<32x16xf32> to vector<8x16xf32>
    %230 = vector.extract_strided_slice %196 {offsets = [0, 24], sizes = [16, 8], strides = [1, 1]} : vector<16x32xf32> to vector<16x8xf32>
    %cst_82 = arith.constant dense<0.000000e+00> : vector<8x8xf32>
    %231 = tpu.matmul %229, %230, %cst_82 {dimension_numbers = #tpu.dot_dimension_numbers<[1], [0], [0], [1], [0, 0, 1, 1], [], []>} : vector<8x16xf32>, vector<16x8xf32>, vector<8x8xf32> -> vector<8x8xf32>
    %232 = tpu.concatenate %222, %225, %228, %231 in 1 : vector<8x8xf32>, vector<8x8xf32>, vector<8x8xf32>, vector<8x8xf32> -> vector<8x32xf32>
    %233 = tpu.concatenate %193, %232 in 0 : vector<8x32xf32>, vector<8x32xf32> -> vector<16x32xf32>
    %c0_83 = arith.constant 0 : index
    %c224 = arith.constant 224 : index
    %234 = vector.load %arg4[%c0_83, %c224] : memref<32x448xf32, #tpu.memory_space<vmem>>, vector<32x32xf32>
    %cst_84 = arith.constant dense<0.000000e+00> : vector<16x32xf32>
    %235 = tpu.matmul %233, %234, %cst_84 {dimension_numbers = #tpu.dot_dimension_numbers<[1], [0], [0], [1], [0, 0, 1, 1], [], []>} : vector<16x32xf32>, vector<32x32xf32>, vector<16x32xf32> -> vector<16x32xf32>
    %c4 = arith.constant 4 : index
    %c0_85 = arith.constant 0 : index
    %236 = vector.load %arg6[%c4, %c0_85] : memref<16x96xf32, #tpu.memory_space<vmem>>, vector<1x32xf32>
    %237 = vector.broadcast %236 : vector<1x32xf32> to vector<16x32xf32>
    %238 = arith.addf %235, %237 : vector<16x32xf32>
    %239 = arith.addf %142, %238 : vector<16x32xf32>
    %c8 = arith.constant 8 : index
    %c0_86 = arith.constant 0 : index
    %240 = vector.load %arg6[%c8, %c0_86] : memref<16x96xf32, #tpu.memory_space<vmem>>, vector<1x32xf32>
    %c9 = arith.constant 9 : index
    %c0_87 = arith.constant 0 : index
    %241 = vector.load %arg6[%c9, %c0_87] : memref<16x96xf32, #tpu.memory_space<vmem>>, vector<1x32xf32>
    %cst_88 = arith.constant dense<0.000000e+00> : vector<16xf32>
    %242 = vector.multi_reduction <add>, %239, %cst_88 [1] : vector<16x32xf32> to vector<16xf32>
    %243 = vector.shape_cast %242 : vector<16xf32> to vector<16x1xf32>
    %cst_89 = arith.constant 3.200000e+01 : f32
    %244 = vector.broadcast %cst_89 : f32 to vector<16x1xf32>
    %245 = arith.divf %243, %244 : vector<16x1xf32>
    %246 = vector.broadcast %245 : vector<16x1xf32> to vector<16x32xf32>
    %247 = arith.subf %239, %246 : vector<16x32xf32>
    %248 = arith.mulf %247, %247 : vector<16x32xf32>
    %cst_90 = arith.constant dense<0.000000e+00> : vector<16xf32>
    %249 = vector.multi_reduction <add>, %248, %cst_90 [1] : vector<16x32xf32> to vector<16xf32>
    %250 = vector.shape_cast %249 : vector<16xf32> to vector<16x1xf32>
    %cst_91 = arith.constant 3.200000e+01 : f32
    %251 = vector.broadcast %cst_91 : f32 to vector<16x1xf32>
    %252 = arith.divf %250, %251 : vector<16x1xf32>
    %253 = vector.broadcast %245 : vector<16x1xf32> to vector<16x32xf32>
    %254 = arith.subf %239, %253 : vector<16x32xf32>
    %cst_92 = arith.constant 9.99999974E-6 : f32
    %255 = vector.broadcast %cst_92 : f32 to vector<16x1xf32>
    %256 = arith.addf %252, %255 : vector<16x1xf32>
    %257 = math.rsqrt %256 : vector<16x1xf32>
    %258 = vector.broadcast %257 : vector<16x1xf32> to vector<16x32xf32>
    %259 = arith.mulf %254, %258 : vector<16x32xf32>
    %260 = vector.broadcast %240 : vector<1x32xf32> to vector<16x32xf32>
    %261 = arith.mulf %259, %260 : vector<16x32xf32>
    %262 = vector.broadcast %241 : vector<1x32xf32> to vector<16x32xf32>
    %263 = arith.addf %261, %262 : vector<16x32xf32>
    %c0_93 = arith.constant 0 : index
    %c256 = arith.constant 256 : index
    %264 = vector.load %arg4[%c0_93, %c256] : memref<32x448xf32, #tpu.memory_space<vmem>>, vector<32x64xf32>
    %cst_94 = arith.constant dense<0.000000e+00> : vector<16x64xf32>
    %265 = tpu.matmul %263, %264, %cst_94 {dimension_numbers = #tpu.dot_dimension_numbers<[1], [0], [0], [1], [0, 0, 1, 1], [], []>} : vector<16x32xf32>, vector<32x64xf32>, vector<16x64xf32> -> vector<16x64xf32>
    %c2 = arith.constant 2 : index
    %c0_95 = arith.constant 0 : index
    %266 = vector.load %arg6[%c2, %c0_95] : memref<16x96xf32, #tpu.memory_space<vmem>>, vector<1x64xf32>
    %267 = vector.broadcast %266 : vector<1x64xf32> to vector<16x64xf32>
    %268 = arith.addf %265, %267 : vector<16x64xf32>
    %cst_96 = arith.constant 0.000000e+00 : f32
    %269 = vector.broadcast %cst_96 : f32 to vector<16x64xf32>
    %270 = arith.maximumf %268, %269 : vector<16x64xf32>
    %c0_97 = arith.constant 0 : index
    %c320 = arith.constant 320 : index
    %271 = vector.load %arg4[%c0_97, %c320] : memref<32x448xf32, #tpu.memory_space<vmem>>, vector<32x64xf32>
    %cst_98 = arith.constant dense<0.000000e+00> : vector<16x32xf32>
    %272 = tpu.matmul %270, %271, %cst_98 {dimension_numbers = #tpu.dot_dimension_numbers<[1], [1], [0], [0], [0, 0, 1, 0], [], []>} : vector<16x64xf32>, vector<32x64xf32>, vector<16x32xf32> -> vector<16x32xf32>
    %c5 = arith.constant 5 : index
    %c0_99 = arith.constant 0 : index
    %273 = vector.load %arg6[%c5, %c0_99] : memref<16x96xf32, #tpu.memory_space<vmem>>, vector<1x32xf32>
    %274 = vector.broadcast %273 : vector<1x32xf32> to vector<16x32xf32>
    %275 = arith.addf %272, %274 : vector<16x32xf32>
    %276 = arith.addf %263, %275 : vector<16x32xf32>
    %c10 = arith.constant 10 : index
    %c0_100 = arith.constant 0 : index
    %277 = vector.load %arg6[%c10, %c0_100] : memref<16x96xf32, #tpu.memory_space<vmem>>, vector<1x32xf32>
    %c11 = arith.constant 11 : index
    %c0_101 = arith.constant 0 : index
    %278 = vector.load %arg6[%c11, %c0_101] : memref<16x96xf32, #tpu.memory_space<vmem>>, vector<1x32xf32>
    %cst_102 = arith.constant dense<0.000000e+00> : vector<16xf32>
    %279 = vector.multi_reduction <add>, %276, %cst_102 [1] : vector<16x32xf32> to vector<16xf32>
    %280 = vector.shape_cast %279 : vector<16xf32> to vector<16x1xf32>
    %cst_103 = arith.constant 3.200000e+01 : f32
    %281 = vector.broadcast %cst_103 : f32 to vector<16x1xf32>
    %282 = arith.divf %280, %281 : vector<16x1xf32>
    %283 = vector.broadcast %282 : vector<16x1xf32> to vector<16x32xf32>
    %284 = arith.subf %276, %283 : vector<16x32xf32>
    %285 = arith.mulf %284, %284 : vector<16x32xf32>
    %cst_104 = arith.constant dense<0.000000e+00> : vector<16xf32>
    %286 = vector.multi_reduction <add>, %285, %cst_104 [1] : vector<16x32xf32> to vector<16xf32>
    %287 = vector.shape_cast %286 : vector<16xf32> to vector<16x1xf32>
    %cst_105 = arith.constant 3.200000e+01 : f32
    %288 = vector.broadcast %cst_105 : f32 to vector<16x1xf32>
    %289 = arith.divf %287, %288 : vector<16x1xf32>
    %290 = vector.broadcast %282 : vector<16x1xf32> to vector<16x32xf32>
    %291 = arith.subf %276, %290 : vector<16x32xf32>
    %cst_106 = arith.constant 9.99999974E-6 : f32
    %292 = vector.broadcast %cst_106 : f32 to vector<16x1xf32>
    %293 = arith.addf %289, %292 : vector<16x1xf32>
    %294 = math.rsqrt %293 : vector<16x1xf32>
    %295 = vector.broadcast %294 : vector<16x1xf32> to vector<16x32xf32>
    %296 = arith.mulf %291, %295 : vector<16x32xf32>
    %297 = vector.broadcast %277 : vector<1x32xf32> to vector<16x32xf32>
    %298 = arith.mulf %296, %297 : vector<16x32xf32>
    %299 = vector.broadcast %278 : vector<1x32xf32> to vector<16x32xf32>
    %300 = arith.addf %298, %299 : vector<16x32xf32>
    %c0_107 = arith.constant 0 : index
    %c0_108 = arith.constant 0 : index
    %301 = vector.load %arg7[%c0_107, %c0_108] : memref<16x32xf32, #tpu.memory_space<vmem>>, vector<16x32xf32>
    tpu.vector_store %arg7[%c0_107, %c0_108], %300 {strides = array<i32>} : memref<16x32xf32, #tpu.memory_space<vmem>>, vector<16x32xf32>,
    return
  }
}

</mosaic_0001>

<bundles_post_ra>
// kernel: _forward.1
= control target key start
LH: loop header
LB: loop body
LE: loop exit
PB: predicated region body
PF: predicated region fallthrough
CT: control target
= control target key end

     0   :  { %12 = vsyncpa [#allocation3], 0  ;;  %s5517_s0 = inlined_call_operand.hbm [shape: f32[16,32], index: 0, kind: input, shape index: {}]   ;;  %s5518_s1 = inlined_call_operand.vmem [shape: f32[32,32], index: 1, kind: input, shape index: {}]   ;;  %s5519_s2 = inlined_call_operand.vmem [shape: f32[16,8], index: 2, kind: input, shape index: {}]   ;;  %s5520_s3 = inlined_call_operand.vmem [shape: f32[32,8], index: 3, kind: input, shape index: {}]   ;;  %s5521_s4 = inlined_call_operand.vmem [shape: f32[32,448], index: 4, kind: input, shape index: {}]   ;;  %s5522_s5 = inlined_call_operand.hbm [shape: f32[8,64], index: 5, kind: input, shape index: {}]   ;;  %s5523_s6 = inlined_call_operand.hbm [shape: f32[16,96], index: 6, kind: input, shape index: {}]   ;;  %s5524_s7 = inlined_call_operand.hbm [shape: f32[16,32], index: 7, kind: output, shape index: {}]  }
   0x1   :  { %13 = vsyncpa [#allocation6], 0 }
   0x2   :  { %14 = vsyncpa [#allocation4], 0  ;;  %s4832_s24 = smov [#allocation5]   ;;  %s4833_s26 = smov [#allocation2]  }
   0x3   :  { %s41_s25 = sshll.u32 %s4832_s24, 4  ;;  %s20_s27 = sshll.u32 %s4833_s26, 4  ;;  %s42_s25 = int_to_ptr.vmem [resolvable:$true] %s41_s25  ;;  %s21_s27 = int_to_ptr.vmem [resolvable:$true] %s20_s27 }
   0x4   :  { %s4754_s28 = scalar_lea.vmem %s42_s25, 128  ;;  %p4759_p1 = scmp.lt.s32.totalorder %s42_s25, %s42_s25 }
   0x5   :  { %p4755_p0 = scmp.ne.s32.totalorder %s42_s25, %s4754_s28  ;;  %p4760_p2 = scmp.lt.s32.totalorder %s4754_s28, %s4754_s28 }
   0x7   :  { %p4761_p3 = por %p4760_p2, %p4759_p1 }
   0x9   :  { %p4762_p4 = pnand %p4761_p3, %p4755_p0 }
   0xb   :  { %4765 = shalt.err (!%p4762_p4)
}
   0xc   :  { %44 = dma.hbm_to_vmem [thread:$0]  %s5522_s5, 128, %s42_s25, [#allocation6]  }
   0xd   :  { %s4774_s8 = scalar_lea.vmem %s21_s27, 256  ;;  %p4779_p6 = scmp.lt.s32.totalorder %s21_s27, %s21_s27 }
   0xe   :  { %p4775_p5 = scmp.ne.s32.totalorder %s21_s27, %s4774_s8  ;;  %p4780_p7 = scmp.lt.s32.totalorder %s4774_s8, %s4774_s8 }
  0x10   :  { %p4781_p8 = por %p4780_p7, %p4779_p6 }
  0x12   :  { %p4782_p9 = pnand %p4781_p8, %p4775_p5 }
  0x14   :  { %4785 = shalt.err (!%p4782_p9)
}
  0x15   :  { %s4834_s9 = smov 128   ;;  %s4835_s10 = smov 8  }
  0x16   :  { %26 = dma.hbm_to_vmem [thread:$0]  %s5517_s0, 256, %s21_s27, [#allocation3], %s4834_s9, %s4834_s9, %s4835_s10  }
  0x17   :  { %s4836_s13 = smov [#allocation7]  }
  0x18   :  { %s50_s14 = sshll.u32 %s4836_s13, 4  ;;  %s51_s14 = int_to_ptr.vmem [resolvable:$true] %s50_s14 }
  0x19   :  { %s4794_s5 = scalar_lea.vmem %s51_s14, 256  ;;  %p4799_p11 = scmp.lt.s32.totalorder %s51_s14, %s51_s14 }
  0x1a   :  { %p4795_p10 = scmp.ne.s32.totalorder %s51_s14, %s4794_s5  ;;  %p4800_p12 = scmp.lt.s32.totalorder %s4794_s5, %s4794_s5 }
  0x1c   :  { %p4801_p13 = por %p4800_p12, %p4799_p11 }
  0x1e   :  { %p4802_p0 = pnand %p4801_p13, %p4795_p10 }
  0x20   :  { %4805 = shalt.err (!%p4802_p0)
}
  0x21   :  { %56 = dma.hbm_to_vmem [thread:$0]  %s5523_s6, 256, %s51_s14, [#allocation6], %s4834_s9, %s4834_s9, %s4835_s10  }
  0x22   :  { %4826 = dma.done.wait [#allocation3], 256  }
  0x23   :  { %4827 = vsyncadd [#allocation3], 4294967040 }
  0x24   :  { %4828 = dma.done.wait [#allocation6], 384  }
  0x25   :  { %4829 = vsyncadd [#allocation6], 4294966912  ;;  %vm80_vm0 = vcmask 64512   ;;  %v74_v0 = vld [vmem:[#allocation5] sm:$0xff]  ;;  %v72_v1 = vld [vmem:[%s5519_s2] sm:$0xff]  ;;  %s4837_s6 = smov 96  }
  0x26   :  { %v73_v2 = vld [vmem:[%s5519_s2 + $0x8] sm:$0xff]  ;;  %4338 = vmatprep.subr.mxu0 %v74_v0  ;;  %4340 = vmatprep.mubr.msk.f32.mxu0 %vm80_vm0, %v72_v1  ;;  %v255_v3 = vld [vmem:[%s5520_s3] sm:$0xff]  ;;  %v167_v4 = vld [vmem:[%s5521_s4 + $0x78] sm:$0xff]  ;;  %vm173_vm1 = vcmask 261120   ;;  %v4838_v49 = vmov 0.0   ;;  %vm4839_vm2 = vmmov 0  }
  0x27   :  { %4339 = vmatpush3.msra.mxu0 %v74_v0  ;;  %265 = vrot.lane.b32.xlu0 %v74_v0, %s4837_s6  ;;  %v166_v5 = vld [vmem:[%s5521_s4 + $0x58] sm:$0xff]  ;;  %v256_v9 = vld [vmem:[%s5520_s3 + $0x8] sm:$0xff]  ;;  %v257_v10 = vld [vmem:[%s5520_s3 + $0x10] sm:$0xff]  ;;  %s4840_s19 = smov 88   ;;  %s4841_s20 = smov 80   ;;  %vm1251_vm3 = vcmask 130048  }
  0x28   :  { %4341 = vmatmul.mubr.msk.f32.vlgmr.msra.gmra.mxu0 %vm80_vm0, %v73_v2  ;;  %4343 = vmatprep.subr.mxu1 %v167_v4  ;;  %v165_v6 = vld [vmem:[%s5521_s4 + $0x38] sm:$0xff]  ;;  %v4088_v16 = vld [vmem:[#allocation7 + $0xc] ss:$0 sm:$0xff]  ;;  %v4094_v24 = vld [vmem:[#allocation7 + $0xe] ss:$0 sm:$0xff]  ;;  %s4842_s21 = smov 120  }
  0x29   :  { %4356 = vmatprep.mubr.msk.f32.mxu0 %vm80_vm0, %v255_v3  ;;  %4344 = vmatpush3.msra.mxu1 %v167_v4  ;;  %v164_v7 = vld [vmem:[%s5521_s4 + $0x18] sm:$0xff]  ;;  %v4953_v18 = vld [vmem:[%s5521_s4 + $0x60] sm:$0xff]  ;;  %v4988_v45 = vld [vmem:[#allocation2 + $0x8] sm:$0xff]  ;;  %s4843_s22 = smov 112   ;;  %s4844_s23 = smov 72   ;;  %vm1253_vm4 = vcmask 195584  }
  0x2a   :  { %4345 = vmatprep.subr.mxu1 %v166_v5  ;;  %382 = vrot.lane.b32.xlu1 %v166_v5, %s4837_s6  ;;  %v258_v11 = vld [vmem:[%s5520_s3 + $0x18] sm:$0xff]  ;;  %v4962_v35 = vld [vmem:[%s5521_s4 + $0x40] sm:$0xff]  ;;  %s4845_s2 = smov 104   ;;  %s4846_s24 = smov 64   ;;  %vm3936_vm5 = vcmask 523264  }
  0x2b   :  { %384 = vrot.lane.b32.xlu0 %v167_v4, %s4837_s6  ;;  %4346 = vmatpush3.msra.mxu1 %v166_v5  ;;  %v4969_v38 = vld [vmem:[%s5521_s4 + $0x20] sm:$0xff]  ;;  %v4104_v57 = vld [vmem:[#allocation7] ss:$0 sm:$0xff]  ;;  %s4847_s25 = smov 48   ;;  %s4848_s26 = smov 40  }
  0x2c   :  { %4347 = vmatprep.subr.mxu1 %v165_v6  ;;  %v4977_v39 = vld [vmem:[%s5521_s4] sm:$0xff]  ;;  %s4849_s27 = smov 56   ;;  %s4850_s28 = smov 32  }
  0x2d   :  { %4348 = vmatpush3.msra.mxu1 %v165_v6  ;;  %v4091_v40 = vld [vmem:[#allocation7 + $0xd] ss:$0 sm:$0xff]  ;;  %v5000_v50 = vld [vmem:[#allocation7 + $0xf] ss:$0 sm:$0xff]  ;;  %s4851_s29 = smov 16   ;;  %s4852_s30 = smov 24  }
  0x2e   :  { %4349 = vmatprep.subr.mxu1 %v164_v7  ;;  %380 = vrot.lane.b32.xlu1 %v165_v6, %s4837_s6  ;;  %v4986_v43 = vld [vmem:[#allocation2] sm:$0xff] }
  0x2f   :  { %4350 = vmatpush3.msra.mxu1 %v164_v7  ;;  %378 = vrot.lane.b32.xlu0 %v164_v7, %s4837_s6 }
  0x30   :  { %4387 = vmatprep.subr.mxu1 %v4838_v49 }
  0x99   :  { %v266_v8 = vpop.permute.xlu0 %265 }
  0x9a   :  { %4354 = vmatprep.subr.mxu0 %v266_v8 }
  0x9b   :  { %4355 = vmatpush3.msra.mxu0 %v266_v8 }
  0x9c   :  { %4357 = vmatmul.mubr.msk.f32.vlgmr.msra.gmra.mxu0 %vm80_vm0, %v256_v9  ;;  %v383_v13 = vpop.permute.xlu1 %382 }
  0x9d   :  { %4359 = vmatprep.mubr.msk.f32.mxu0 %vm80_vm0, %v257_v10  ;;  %v385_v12 = vpop.permute.xlu0 %384 }
  0x9e   :  { %4362 = vmatprep.subr.mxu0 %v385_v12 }
  0x9f   :  { %4363 = vmatpush3.msra.mxu0 %v385_v12 }
  0xa0   :  { %4360 = vmatmul.mubr.msk.f32.gmra.mxu0 %vm80_vm0, %v258_v11  ;;  %4364 = vmatprep.subr.mxu0 %v383_v13  ;;  %v381_v14 = vpop.permute.xlu1 %380 }
  0xa1   :  { %4365 = vmatpush3.msra.mxu0 %v383_v13  ;;  %v379_v15 = vpop.permute.xlu0 %378 }
  0xa2   :  { %4366 = vmatprep.subr.mxu0 %v381_v14 }
  0xa3   :  { %4367 = vmatpush3.msra.mxu0 %v381_v14 }
  0xa4   :  { %4368 = vmatprep.subr.mxu0 %v379_v15 }
  0xa5   :  { %4369 = vmatpush3.msra.mxu0 %v379_v15 }
  0xa6   :  { %4376 = vmatprep.subr.mxu0 %v4953_v18 }
  0xe8   :  { %v4342_v17 = vpop.f32.mrf.mxu0 }
  0xe9   :  { %v159_v19 = vadd.f32 %v4342_v17, %v4088_v16 }
  0xea   :  { %v153_v20 = vpop.f32.mrf.mxu0 }
  0xeb   :  { %v154_v21 = vadd.f32 %v4088_v16, %v153_v20  ;;  %v163_v23 = vmax.f32 %v159_v19, 0.0 }
  0xed   :  { %v162_v22 = vmax.f32 %v154_v21, 0.0 }
  0xef   :  { %4351 = vmatprep.mubr.msk.f32.mxu1 %vm173_vm1, %v162_v22 }
  0xf0   :  { %4352 = vmatmul.mubr.msk.f32.vlgmr.msra.gmra.mxu1 %vm173_vm1, %v163_v23 }
  0xf1   :  { %4389 = vmatprep.mubr.msk.f32.mxu1 %vm4839_vm2, %v4838_v49 }
 0x15c   :  { %v4358_v25 = vpop.f32.mrf.mxu0 }
 0x15d   :  { %v352_v26 = vadd.f32 %v4358_v25, %v4094_v24 }
 0x15e   :  { %v346_v27 = vpop.f32.mrf.mxu0 }
 0x15f   :  { %v347_v28 = vadd.f32 %v4094_v24, %v346_v27  ;;  %v366_v29 = vmax.f32 %v352_v26, 0.0 }
 0x160   :  { %v4361_v30 = vpop.f32.mrf.mxu0 }
 0x161   :  { %v365_v31 = vmax.f32 %v347_v28, 0.0  ;;  %v362_v32 = vadd.f32 %v4361_v30, %v4094_v24 }
 0x162   :  { %v356_v33 = vpop.f32.mrf.mxu0 }
 0x163   :  { %v357_v34 = vadd.f32 %v4094_v24, %v356_v33  ;;  %4370 = vmatprep.mubr.msk.f32.mxu0 %vm173_vm1, %v365_v31  ;;  %v368_v36 = vmax.f32 %v362_v32, 0.0 }
 0x164   :  { %4371 = vmatmul.mubr.msk.f32.vlgmr.msra.gmra.mxu0 %vm173_vm1, %v366_v29 }
 0x165   :  { %v367_v37 = vmax.f32 %v357_v34, 0.0  ;;  %4377 = vmatpush3.msra.mxu0 %v4953_v18 }
 0x166   :  { %4378 = vmatprep.subr.mxu0 %v4962_v35 }
 0x167   :  { %4373 = vmatprep.mubr.msk.f32.mxu0 %vm173_vm1, %v367_v37  ;;  %4379 = vmatpush3.msra.mxu0 %v4962_v35 }
 0x168   :  { %4374 = vmatmul.mubr.msk.f32.gmra.mxu0 %vm173_vm1, %v368_v36  ;;  %4380 = vmatprep.subr.mxu0 %v4969_v38 }
 0x169   :  { %4381 = vmatpush3.msra.mxu0 %v4969_v38 }
 0x16a   :  { %4382 = vmatprep.subr.mxu0 %v4977_v39 }
 0x16b   :  { %4383 = vmatpush3.msra.mxu0 %v4977_v39 }
 0x16c   :  { %4392 = vmatprep.subr.mxu0 %v4838_v49 }
 0x1b0   :  { %v4353_v41 = vpop.f32.mrf.mxu1 }
 0x1b1   :  { %v4984_v42 = vadd.f32 %v4353_v41, %v4091_v40 }
 0x1b2   :  { %v246_v44 = vpop.f32.mrf.mxu1 }
 0x1b3   :  { %v4990_v46 = vadd.f32 %v4091_v40, %v246_v44  ;;  %v488_v48 = vadd.f32 %v4984_v42, %v4988_v45 }
 0x1b5   :  { %v487_v47 = vadd.f32 %v4990_v46, %v4986_v43 }
 0x1b7   :  { %4384 = vmatprep.mubr.msk.f32.mxu0 %vm173_vm1, %v487_v47 }
 0x1b8   :  { %4385 = vmatmul.mubr.msk.f32.vlgmr.msra.gmra.mxu0 %vm173_vm1, %v488_v48 }
 0x1b9   :  { %4394 = vmatprep.mubr.msk.f32.mxu0 %vm4839_vm2, %v4838_v49 }
 0x224   :  { %v4372_v51 = vpop.f32.mrf.mxu0 }
 0x225   :  { %v5003_v52 = vadd.f32 %v4372_v51, %v5000_v50 }
 0x226   :  { %v5005_v53 = vpop.f32.mrf.mxu0 }
 0x228   :  { %v4375_v54 = vpop.f32.mrf.mxu0 }
 0x229   :  { %v5008_v55 = vadd.f32 %v4375_v54, %v5000_v50 }
 0x22a   :  { %v5014_v56 = vpop.f32.mrf.mxu0 }
 0x278   :  { %v4386_v58 = vpop.f32.mrf.mxu0 }
 0x279   :  { %v5016_v59 = vadd.f32 %v4386_v58, %v4104_v57 }
 0x27a   :  { %v570_v60 = vpop.f32.mrf.mxu0 }
 0x27b   :  { %v571_v61 = vadd.f32 %v4104_v57, %v570_v60 }
 0x27d   :  { %658 = vrot.lane.b32.xlu0 %v571_v61, %s4840_s19  ;;  %580 = vrot.lane.b32.xlu1 %v571_v61, %s4837_s6 }
 0x281   :  { %736 = vrot.lane.b32.xlu0 %v571_v61, %s4841_s20  ;;  %656 = vrot.lane.b32.xlu1 %v571_v61, %s4842_s21 }
 0x285   :  { %734 = vrot.lane.b32.xlu0 %v571_v61, %s4843_s22  ;;  %814 = vrot.lane.b32.xlu1 %v571_v61, %s4844_s23 }
 0x289   :  { %812 = vrot.lane.b32.xlu1 %v571_v61, %s4845_s2 }
 0x2ef   :  { %v659_v62 = vpop.permute.xlu0 %658  ;;  %v581_v63 = vpop.permute.xlu1 %580 }
 0x2f0   :  { %4388 = vmatpush3.xpose.msk.msra.mxu1 %vm80_vm0, %v581_v63  ;;  %4393 = vmatpush3.xpose.msk.msra.mxu0 %vm80_vm0, %v659_v62 }
 0x2f1   :  { %4397 = vmatprep.subr.mxu1 %v4838_v49  ;;  %4402 = vmatprep.subr.mxu0 %v4838_v49 }
 0x2f3   :  { %v737_v0 = vpop.permute.xlu0 %736  ;;  %4390 = vmatmul.mubr.msk.f32.vlgmr.msra.gmra.mxu1 %vm80_vm0, %v571_v61  ;;  %v657_v1 = vpop.permute.xlu1 %656 }
 0x2f4   :  { %4395 = vmatmul.mubr.msk.f32.vlgmr.msra.gmra.mxu0 %vm80_vm0, %v657_v1  ;;  %4398 = vmatpush3.xpose.msk.msra.mxu1 %vm80_vm0, %v737_v0 }
 0x2f5   :  { %4399 = vmatprep.mubr.msk.f32.mxu1 %vm4839_vm2, %v4838_v49  ;;  %4404 = vmatprep.mubr.msk.f32.mxu0 %vm4839_vm2, %v4838_v49 }
 0x2f6   :  { %4407 = vmatprep.subr.mxu1 %v4838_v49 }
 0x2f7   :  { %v735_v2 = vpop.permute.xlu0 %734  ;;  %v815_v3 = vpop.permute.xlu1 %814 }
 0x2f8   :  { %4400 = vmatmul.mubr.msk.f32.vlgmr.msra.gmra.mxu1 %vm80_vm0, %v735_v2  ;;  %4403 = vmatpush3.xpose.msk.msra.mxu0 %vm80_vm0, %v815_v3 }
 0x2f9   :  { %4412 = vmatprep.subr.mxu0 %v4838_v49  ;;  %4409 = vmatprep.mubr.msk.f32.mxu1 %vm4839_vm2, %v4838_v49 }
 0x2fb   :  { %v813_v4 = vpop.permute.xlu1 %812 }
 0x2fc   :  { %4405 = vmatmul.mubr.msk.f32.vlgmr.msra.gmra.mxu0 %vm80_vm0, %v813_v4 }
 0x2fd   :  { %4414 = vmatprep.mubr.msk.f32.mxu0 %vm4839_vm2, %v4838_v49 }
 0x3b3   :  { %v652_v5 = vpop.f32.mrf.mxu1 }
 0x3b4   :  { %v730_v6 = vpop.f32.mrf.mxu0  ;;  %v890_v7 = vsel %vm80_vm0, %v652_v5, -inf }
 0x3b5   :  { %891 = vmax.xlane.f32.xlu0 %v890_v7  ;;  %v4391_v8 = vpop.f32.mrf.mxu1  ;;  %v893_v9 = vsel %vm80_vm0, %v730_v6, -inf }
 0x3b6   :  { %894 = vmax.xlane.f32.xlu1 %v893_v9  ;;  %v4396_v10 = vpop.f32.mrf.mxu0 }
 0x3b8   :  { %v808_v11 = vpop.f32.mrf.mxu1 }
 0x3b9   :  { %v896_v12 = vsel %vm80_vm0, %v808_v11, -inf }
 0x3ba   :  { %897 = vmax.xlane.f32.xlu0 %v896_v12  ;;  %v4401_v13 = vpop.f32.mrf.mxu1 }
 0x3bc   :  { %v886_v14 = vpop.f32.mrf.mxu0 }
 0x3bd   :  { %v899_v15 = vsel %vm80_vm0, %v886_v14, -inf }
 0x3be   :  { %900 = vmax.xlane.f32.xlu0 %v899_v15  ;;  %v4406_v16 = vpop.f32.mrf.mxu0 }
 0x3c7   :  { %934 = vrot.lane.b32.xlu1 %v571_v61, %s4846_s24 }
 0x3cb   :  { %1086 = vrot.lane.b32.xlu1 %v571_v61, %s4847_s25 }
 0x3cf   :  { %1162 = vrot.lane.b32.xlu1 %v571_v61, %s4848_s26 }
 0x3d3   :  { %1334 = vrot.lane.b32.xlu1 %v5016_v59, %s4840_s19 }
 0x3d4   :  { %1010 = vrot.lane.b32.xlu0 %v571_v61, %s4849_s27 }
 0x3d8   :  { %1256 = vrot.lane.b32.xlu0 %v5016_v59, %s4837_s6 }
 0x43e   :  { %v892_v17 = vpop.xlane.xlu0 %891 }
 0x43f   :  { %v902_v19 = vsub.f32 %v652_v5, %v892_v17  ;;  %v895_v20 = vpop.xlane.xlu1 %894 }
 0x440   :  { %v903_v21 = vsub.f32 %v730_v6, %v895_v20 }
 0x441   :  { %v906_v22 = vmul.f32 1.442695, %v902_v19 }
 0x442   :  { %v908_v23 = vmul.f32 1.442695, %v903_v21 }
 0x443   :  { %4670 = vpow2.f32 %v906_v22  ;;  %v898_v24 = vpop.xlane.xlu0 %897  ;;  %v935_v25 = vpop.permute.xlu1 %934 }
 0x444   :  { %4672 = vpow2.f32 %v908_v23  ;;  %v904_v26 = vsub.f32 %v808_v11, %v898_v24  ;;  %4408 = vmatpush3.msra.mxu1 %v935_v25 }
 0x445   :  { %4417 = vmatprep.subr.mxu1 %v4838_v49 }
 0x446   :  { %v910_v27 = vmul.f32 1.442695, %v904_v26 }
 0x447   :  { %v901_v28 = vpop.xlane.xlu0 %900  ;;  %v1087_v47 = vpop.permute.xlu1 %1086 }
 0x448   :  { %4674 = vpow2.f32 %v910_v27  ;;  %v905_v29 = vsub.f32 %v886_v14, %v901_v28 }
 0x44a   :  { %v912_v30 = vmul.f32 1.442695, %v905_v29 }
 0x44b   :  { %v1011_v31 = vpop.permute.xlu0 %1010  ;;  %v1163_v48 = vpop.permute.xlu1 %1162 }
 0x44c   :  { %4676 = vpow2.f32 %v912_v30  ;;  %4413 = vmatpush3.msra.mxu0 %v1011_v31 }
 0x44d   :  { %4422 = vmatprep.subr.mxu0 %v4838_v49 }
 0x44f   :  { %v1335_v51 = vpop.permute.xlu1 %1334  ;;  %v1257_v54 = vpop.permute.xlu0 %1256 }
 0x450   :  { %v4671_v32 = vpop.eup %4670 }
 0x451   :  { %v4673_v33 = vpop.eup %4672  ;;  %v914_v34 = vsel %vm80_vm0, %v4671_v32, 0.0 }
 0x452   :  { %915 = vadd.xlane.f32.xlu1 %v914_v34  ;;  %v917_v36 = vsel %vm80_vm0, %v4673_v33, 0.0 }
 0x453   :  { %918 = vadd.xlane.f32.xlu0 %v917_v36 }
 0x455   :  { %v4675_v37 = vpop.eup %4674 }
 0x456   :  { %v920_v40 = vsel %vm80_vm0, %v4675_v37, 0.0 }
 0x457   :  { %921 = vadd.xlane.f32.xlu1 %v920_v40 }
 0x459   :  { %v4677_v41 = vpop.eup %4676 }
 0x45a   :  { %v923_v44 = vsel %vm80_vm0, %v4677_v41, 0.0 }
 0x45b   :  { %924 = vadd.xlane.f32.xlu0 %v923_v44 }
 0x468   :  { %1412 = vrot.lane.b32.xlu1 %v5016_v59, %s4841_s20 }
 0x46c   :  { %1410 = vrot.lane.b32.xlu1 %v5016_v59, %s4843_s22 }
 0x471   :  { %1332 = vrot.lane.b32.xlu0 %v5016_v59, %s4842_s21 }
 0x475   :  { %1490 = vrot.lane.b32.xlu0 %v5016_v59, %s4844_s23 }
 0x479   :  { %1488 = vrot.lane.b32.xlu0 %v5016_v59, %s4845_s2 }
 0x4db   :  { %v916_v57 = vpop.xlane.xlu1 %915 }
 0x4dc   :  { %4678 = vrcp.f32 %v916_v57  ;;  %v919_v58 = vpop.xlane.xlu0 %918 }
 0x4dd   :  { %4680 = vrcp.f32 %v919_v58 }
 0x4e0   :  { %v922_v60 = vpop.xlane.xlu1 %921 }
 0x4e1   :  { %4682 = vrcp.f32 %v922_v60 }
 0x4e4   :  { %v925_v61 = vpop.xlane.xlu0 %924  ;;  %v1413_v6 = vpop.permute.xlu1 %1412 }
 0x4e5   :  { %4684 = vrcp.f32 %v925_v61 }
 0x4e8   :  { %v1333_v4 = vpop.permute.xlu0 %1332  ;;  %v1411_v9 = vpop.permute.xlu1 %1410 }
 0x4e9   :  { %v4679_v62 = vpop.eup %4678 }
 0x4ea   :  { %v4681_v63 = vpop.eup %4680  ;;  %v930_v0 = vmul.f32 %v4679_v62, %v4671_v32 }
 0x4eb   :  { %v931_v1 = vmul.f32 %v4681_v63, %v4673_v33 }
 0x4ec   :  { %4410 = vmatmul.mubr.msk.f32.vlgmr.msra.gmra.mxu1 %vm80_vm0, %v930_v0  ;;  %v1491_v8 = vpop.permute.xlu0 %1490 }
 0x4ed   :  { %4418 = vmatpush3.msra.mxu1 %v1087_v47  ;;  %4415 = vmatmul.mubr.msk.f32.vlgmr.msra.gmra.mxu0 %vm80_vm0, %v931_v1 }
 0x4ee   :  { %v4683_v2 = vpop.eup %4682  ;;  %4423 = vmatpush3.msra.mxu0 %v1163_v48  ;;  %4419 = vmatprep.mubr.msk.f32.mxu1 %vm4839_vm2, %v4838_v49 }
 0x4ef   :  { %4427 = vmatprep.subr.mxu1 %v4838_v49  ;;  %v932_v3 = vmul.f32 %v4683_v2, %v4675_v37  ;;  %4424 = vmatprep.mubr.msk.f32.mxu0 %vm4839_vm2, %v4838_v49 }
 0x4f0   :  { %4432 = vmatprep.subr.mxu0 %v4838_v49  ;;  %v1489_v10 = vpop.permute.xlu0 %1488 }
 0x4f1   :  { %4420 = vmatmul.mubr.msk.f32.vlgmr.msra.gmra.mxu1 %vm80_vm0, %v932_v3 }
 0x4f2   :  { %v4685_v5 = vpop.eup %4684  ;;  %4428 = vmatpush3.xpose.msk.msra.mxu1 %vm80_vm0, %v1257_v54  ;;  %4429 = vmatprep.mubr.msk.f32.mxu1 %vm4839_vm2, %v4838_v49 }
 0x4f3   :  { %4437 = vmatprep.subr.mxu1 %v4838_v49  ;;  %v933_v7 = vmul.f32 %v4685_v5, %v4677_v41 }
 0x4f5   :  { %4425 = vmatmul.mubr.msk.f32.vlgmr.msra.gmra.mxu0 %vm80_vm0, %v933_v7  ;;  %4430 = vmatmul.mubr.msk.f32.vlgmr.msra.gmra.mxu1 %vm80_vm0, %v5016_v59 }
 0x4f6   :  { %4433 = vmatpush3.xpose.msk.msra.mxu0 %vm80_vm0, %v1335_v51  ;;  %4438 = vmatpush3.xpose.msk.msra.mxu1 %vm80_vm0, %v1413_v6 }
 0x4f7   :  { %4434 = vmatprep.mubr.msk.f32.mxu0 %vm4839_vm2, %v4838_v49  ;;  %4439 = vmatprep.mubr.msk.f32.mxu1 %vm4839_vm2, %v4838_v49 }
 0x4f8   :  { %4442 = vmatprep.subr.mxu0 %v4838_v49  ;;  %4447 = vmatprep.subr.mxu1 %v4838_v49 }
 0x4f9   :  { %4435 = vmatmul.mubr.msk.f32.vlgmr.msra.gmra.mxu0 %vm80_vm0, %v1333_v4  ;;  %4440 = vmatmul.mubr.msk.f32.vlgmr.msra.gmra.mxu1 %vm80_vm0, %v1411_v9 }
 0x4fa   :  { %4443 = vmatpush3.xpose.msk.msra.mxu0 %vm80_vm0, %v1491_v8  ;;  %4444 = vmatprep.mubr.msk.f32.mxu0 %vm4839_vm2, %v4838_v49 }
 0x4fb   :  { %4452 = vmatprep.subr.mxu0 %v4838_v49  ;;  %4449 = vmatprep.mubr.msk.f32.mxu1 %vm4839_vm2, %v4838_v49 }
 0x4fd   :  { %4445 = vmatmul.mubr.msk.f32.vlgmr.msra.gmra.mxu0 %vm80_vm0, %v1489_v10 }
 0x4fe   :  { %4454 = vmatprep.mubr.msk.f32.mxu0 %vm4839_vm2, %v4838_v49 }
 0x5ac   :  { %v5108_v11 = vpop.f32.mrf.mxu1 }
 0x5ad   :  { %v1082_v12 = vpop.f32.mrf.mxu0 }
 0x5ae   :  { %v4411_v13 = vpop.f32.mrf.mxu1 }
 0x5af   :  { %v4416_v14 = vpop.f32.mrf.mxu0 }
 0x5b1   :  { %v1158_v15 = vpop.f32.mrf.mxu1 }
 0x5b3   :  { %v4421_v16 = vpop.f32.mrf.mxu1 }
 0x5b5   :  { %v5110_v17 = vpop.f32.mrf.mxu0  ;;  %v1328_v19 = vpop.f32.mrf.mxu1 }
 0x5b6   :  { %v1566_v20 = vsel %vm80_vm0, %v1328_v19, -inf }
 0x5b7   :  { %v4426_v21 = vpop.f32.mrf.mxu0  ;;  %1567 = vmax.xlane.f32.xlu1 %v1566_v20  ;;  %v4431_v22 = vpop.f32.mrf.mxu1 }
 0x5b9   :  { %v1406_v23 = vpop.f32.mrf.mxu0  ;;  %v1484_v24 = vpop.f32.mrf.mxu1 }
 0x5ba   :  { %v1569_v25 = vsel %vm80_vm0, %v1406_v23, -inf  ;;  %v1572_v30 = vsel %vm80_vm0, %v1484_v24, -inf }
 0x5bb   :  { %1570 = vmax.xlane.f32.xlu0 %v1569_v25  ;;  %v4436_v26 = vpop.f32.mrf.mxu0  ;;  %v4441_v27 = vpop.f32.mrf.mxu1 }
 0x5bd   :  { %v1562_v28 = vpop.f32.mrf.mxu0 }
 0x5be   :  { %v1575_v29 = vsel %vm80_vm0, %v1562_v28, -inf }
 0x5bf   :  { %v4446_v31 = vpop.f32.mrf.mxu0  ;;  %1576 = vmax.xlane.f32.xlu1 %v1575_v29  ;;  %1573 = vmax.xlane.f32.xlu0 %v1572_v30 }
 0x5d0   :  { %1686 = vrot.lane.b32.xlu1 %v5016_v59, %s4849_s27 }
 0x5d5   :  { %1610 = vrot.lane.b32.xlu0 %v5016_v59, %s4846_s24 }
 0x640   :  { %v1568_v32 = vpop.xlane.xlu1 %1567 }
 0x641   :  { %v1578_v33 = vsub.f32 %v1328_v19, %v1568_v32 }
 0x643   :  { %v1582_v34 = vmul.f32 1.442695, %v1578_v33 }
 0x644   :  { %v1571_v36 = vpop.xlane.xlu0 %1570 }
 0x645   :  { %4686 = vpow2.f32 %v1582_v34  ;;  %v1579_v37 = vsub.f32 %v1406_v23, %v1571_v36  ;;  %v469_v34 = vadd.f32 %v5000_v50, %v5005_v53  ;;  %v68_v36 = vld [vmem:[%s5518_s1] sm:$0xff]  ;;  %v5171_v53 = vld [vmem:[%s5521_s4 + $0x68] sm:$0xff] }
 0x647   :  { %v1584_v40 = vmul.f32 1.442695, %v1579_v37 }
 0x648   :  { %v1574_v41 = vpop.xlane.xlu0 %1573  ;;  %v1577_v44 = vpop.xlane.xlu1 %1576 }
 0x649   :  { %4688 = vpow2.f32 %v1584_v40  ;;  %v1580_v47 = vsub.f32 %v1484_v24, %v1574_v41  ;;  %v1581_v48 = vsub.f32 %v1562_v28, %v1577_v44  ;;  %v2166_v44 = vadd.f32 %v469_v34, %v68_v36 }
 0x64b   :  { %v1586_v51 = vmul.f32 1.442695, %v1580_v47  ;;  %v1588_v54 = vmul.f32 1.442695, %v1581_v48  ;;  %v5178_v48 = vld [vmem:[%s5521_s4 + $0x48] sm:$0xff] }
 0x64c   :  { %v1611_v57 = vpop.permute.xlu0 %1610  ;;  %v1687_v58 = vpop.permute.xlu1 %1686 }
 0x64d   :  { %4690 = vpow2.f32 %v1586_v51  ;;  %4448 = vmatpush3.msra.mxu1 %v1611_v57  ;;  %4453 = vmatpush3.msra.mxu0 %v1687_v58  ;;  %v4131_v51 = vld [vmem:[#allocation7 + $0x3] ss:$0 sm:$0xff] }
 0x64e   :  { %4692 = vpow2.f32 %v1588_v54  ;;  %4457 = vmatprep.subr.mxu1 %v4838_v49  ;;  %4462 = vmatprep.subr.mxu0 %v4838_v49 }
 0x652   :  { %v4687_v60 = vpop.eup %4686 }
 0x653   :  { %v1590_v61 = vsel %vm80_vm0, %v4687_v60, 0.0 }
 0x654   :  { %1591 = vadd.xlane.f32.xlu0 %v1590_v61 }
 0x656   :  { %v4689_v62 = vpop.eup %4688 }
 0x657   :  { %v1593_v63 = vsel %vm80_vm0, %v4689_v62, 0.0 }
 0x658   :  { %1594 = vadd.xlane.f32.xlu1 %v1593_v63 }
 0x65a   :  { %v4691_v0 = vpop.eup %4690 }
 0x65b   :  { %v4693_v1 = vpop.eup %4692  ;;  %v1596_v2 = vsel %vm80_vm0, %v4691_v0, 0.0 }
 0x65c   :  { %1597 = vadd.xlane.f32.xlu0 %v1596_v2  ;;  %v1599_v3 = vsel %vm80_vm0, %v4693_v1, 0.0 }
 0x65d   :  { %1600 = vadd.xlane.f32.xlu1 %v1599_v3 }
 0x66e   :  { %1762 = vrot.lane.b32.xlu1 %v5016_v59, %s4847_s25 }
 0x672   :  { %1944 = vrot.lane.b32.xlu1 %v4953_v18, %s4850_s28  ;;  %1838 = vrot.lane.b32.xlu0 %v5016_v59, %s4848_s26 }
 0x676   :  { %1239 = vrot.lane.b32.xlu1 %v1082_v12, %s4835_s10  ;;  %1942 = vrot.lane.b32.xlu0 %v4962_v35, %s4850_s28 }
 0x67a   :  { %1243 = vrot.lane.b32.xlu1 %v1158_v15, %s4851_s29  ;;  %1940 = vrot.lane.b32.xlu0 %v4969_v38, %s4850_s28 }
 0x67e   :  { %1247 = vrot.lane.b32.xlu1 %v5110_v17, %s4852_s30 }
 0x682   :  { %1938 = vrot.lane.b32.xlu1 %v4977_v39, %s4850_s28 }
 0x6dd   :  { %v1592_v18 = vpop.xlane.xlu0 %1591 }
 0x6de   :  { %4694 = vrcp.f32 %v1592_v18 }
 0x6e1   :  { %v1595_v59 = vpop.xlane.xlu1 %1594 }
 0x6e2   :  { %4696 = vrcp.f32 %v1595_v59 }
 0x6e5   :  { %v1598_v4 = vpop.xlane.xlu0 %1597 }
 0x6e6   :  { %4698 = vrcp.f32 %v1598_v4  ;;  %v1601_v35 = vpop.xlane.xlu1 %1600 }
 0x6e7   :  { %4700 = vrcp.f32 %v1601_v35 }
 0x6e9   :  { %v1839_v9 = vpop.permute.xlu0 %1838 }
 0x6ea   :  { %v1763_v5 = vpop.permute.xlu1 %1762 }
 0x6eb   :  { %v4695_v6 = vpop.eup %4694 }
 0x6ec   :  { %v1606_v7 = vmul.f32 %v4695_v6, %v4687_v60 }
 0x6ed   :  { %v1943_v22 = vpop.permute.xlu0 %1942 }
 0x6ee   :  { %v1945_v8 = vpop.permute.xlu1 %1944  ;;  %4450 = vmatmul.mubr.msk.f32.vlgmr.msra.gmra.mxu1 %vm80_vm0, %v1606_v7 }
 0x6ef   :  { %v4697_v38 = vpop.eup %4696  ;;  %4458 = vmatpush3.msra.mxu1 %v1763_v5  ;;  %4459 = vmatprep.mubr.msk.f32.mxu1 %vm4839_vm2, %v4838_v49 }
 0x6f0   :  { %v1607_v39 = vmul.f32 %v4697_v38, %v4689_v62  ;;  %4467 = vmatprep.subr.mxu1 %v1945_v8 }
 0x6f1   :  { %v1941_v23 = vpop.permute.xlu0 %1940 }
 0x6f2   :  { %v1240_v10 = vpop.permute.xlu1 %1239  ;;  %4455 = vmatmul.mubr.msk.f32.vlgmr.msra.gmra.mxu0 %vm80_vm0, %v1607_v39  ;;  %v5211_v39 = vld [vmem:[#allocation7 + $0x1] ss:$0 sm:$0xff] }
 0x6f3   :  { %v4699_v12 = vpop.eup %4698  ;;  %4463 = vmatpush3.msra.mxu0 %v1839_v9  ;;  %4464 = vmatprep.mubr.msk.f32.mxu0 %vm4839_vm2, %v4838_v49  ;;  %v1250_v17 = vsel %vm80_vm0, %v5108_v11, %v1240_v10 }
 0x6f4   :  { %v4701_v13 = vpop.eup %4700  ;;  %v1608_v14 = vmul.f32 %v4699_v12, %v4691_v0  ;;  %4478 = vmatprep.subr.mxu0 %v5171_v53 }
 0x6f5   :  { %v1609_v15 = vmul.f32 %v4701_v13, %v4693_v1  ;;  %v5191_v1 = vld [vmem:[%s5521_s4 + $0x28] sm:$0xff] }
 0x6f6   :  { %v1244_v16 = vpop.permute.xlu1 %1243  ;;  %4460 = vmatmul.mubr.msk.f32.vlgmr.msra.gmra.mxu1 %vm80_vm0, %v1608_v14 }
 0x6f7   :  { %4465 = vmatmul.mubr.msk.f32.vlgmr.msra.gmra.mxu0 %vm80_vm0, %v1609_v15  ;;  %4468 = vmatpush3.msra.mxu1 %v1945_v8  ;;  %v1252_v19 = vsel %vm1251_vm3, %v1250_v17, %v1244_v16  ;;  %v69_v15 = vld [vmem:[%s5518_s1 + $0x8] sm:$0xff]  ;;  %v479_v16 = vadd.f32 %v5000_v50, %v5014_v56  ;;  %v4134_v56 = vld [vmem:[#allocation7 + $0x6] ss:$0 sm:$0xff] }
 0x6f8   :  { %4469 = vmatprep.subr.mxu1 %v1943_v22  ;;  %4479 = vmatpush3.msra.mxu0 %v5171_v53 }
 0x6f9   :  { %4470 = vmatpush3.msra.mxu1 %v1943_v22  ;;  %4480 = vmatprep.subr.mxu0 %v5178_v48  ;;  %v2167_v22 = vadd.f32 %v5003_v52, %v69_v15 }
 0x6fa   :  { %v1248_v20 = vpop.permute.xlu1 %1247  ;;  %4471 = vmatprep.subr.mxu1 %v1941_v23  ;;  %4481 = vmatpush3.msra.mxu0 %v5178_v48 }
 0x6fb   :  { %v1254_v21 = vsel %vm1253_vm4, %v1252_v19, %v1248_v20  ;;  %4472 = vmatpush3.msra.mxu1 %v1941_v23  ;;  %4482 = vmatprep.subr.mxu0 %v5191_v1  ;;  %v70_v19 = vld [vmem:[%s5518_s1 + $0x10] sm:$0xff]  ;;  %v71_v23 = vld [vmem:[%s5518_s1 + $0x18] sm:$0xff] }
 0x6fc   :  { %4475 = vmatprep.mubr.msk.f32.mxu1 %vm173_vm1, %v1254_v21  ;;  %4483 = vmatpush3.msra.mxu0 %v5191_v1  ;;  %v2169_v50 = vadd.f32 %v5008_v55, %v71_v23 }
 0x6fe   :  { %v1939_v24 = vpop.permute.xlu1 %1938 }
 0x6ff   :  { %4473 = vmatprep.subr.mxu1 %v1939_v24 }
 0x700   :  { %4474 = vmatpush3.msra.mxu1 %v1939_v24  ;;  %v2168_v24 = vadd.f32 %v479_v16, %v70_v19 }
 0x7ae   :  { %v1682_v25 = vpop.f32.mrf.mxu1 }
 0x7b0   :  { %v4451_v26 = vpop.f32.mrf.mxu1 }
 0x7b2   :  { %v1758_v27 = vpop.f32.mrf.mxu0 }
 0x7b3   :  { %1915 = vrot.lane.b32.xlu0 %v1758_v27, %s4835_s10  ;;  %v4135_v27 = vld [vmem:[#allocation7 + $0x7] ss:$0 sm:$0xff] }
 0x7b4   :  { %v4456_v11 = vpop.f32.mrf.mxu0 }
 0x7b6   :  { %v1834_v28 = vpop.f32.mrf.mxu1 }
 0x7b7   :  { %v1910_v29 = vpop.f32.mrf.mxu0  ;;  %1919 = vrot.lane.b32.xlu0 %v1834_v28, %s4851_s29 }
 0x7b8   :  { %v4461_v30 = vpop.f32.mrf.mxu1 }
 0x7b9   :  { %v4466_v31 = vpop.f32.mrf.mxu0 }
 0x7bb   :  { %1923 = vrot.lane.b32.xlu0 %v1910_v29, %s4852_s30 }
 0x825   :  { %v1916_v32 = vpop.permute.xlu0 %1915 }
 0x826   :  { %v1926_v37 = vsel %vm80_vm0, %v1682_v25, %v1916_v32 }
 0x829   :  { %v1920_v33 = vpop.permute.xlu0 %1919 }
 0x82a   :  { %v1927_v40 = vsel %vm1251_vm3, %v1926_v37, %v1920_v33 }
 0x82d   :  { %v1924_v41 = vpop.permute.xlu0 %1923 }
 0x82e   :  { %v1928_v47 = vsel %vm1253_vm4, %v1927_v40, %v1924_v41 }
 0x82f   :  { %4476 = vmatmul.mubr.msk.f32.vlgmr.msra.gmra.mxu1 %vm173_vm1, %v1928_v47 }
 0x830   :  { %4497 = vmatprep.mubr.msk.f32.mxu1 %vm173_vm1, %v2166_v44 }
 0x8ef   :  { %v4477_v54 = vpop.f32.mrf.mxu1 }
 0x8f0   :  { %v2028_v57 = vadd.f32 %v4477_v54, %v4131_v51 }
 0x8f1   :  { %v2022_v58 = vpop.f32.mrf.mxu1 }
 0x8f2   :  { %v2023_v60 = vadd.f32 %v4131_v51, %v2022_v58  ;;  %v2032_v61 = vadd.f32 %v2028_v57, %v4988_v45 }
 0x8f4   :  { %v2038_v62 = vsel %vm173_vm1, %v2032_v61, 0.0  ;;  %v2031_v63 = vadd.f32 %v2023_v60, %v4986_v43  ;;  %v5200_v43 = vld [vmem:[%s5521_s4 + $0x8] sm:$0xff] }
 0x8f5   :  { %2039 = vadd.xlane.f32.xlu0 %v2038_v62  ;;  %4484 = vmatprep.subr.mxu0 %v5200_v43 }
 0x8f6   :  { %v2035_v0 = vsel %vm173_vm1, %v2031_v63, 0.0  ;;  %4485 = vmatpush3.msra.mxu0 %v5200_v43 }
 0x8f7   :  { %2036 = vadd.xlane.f32.xlu1 %v2035_v0  ;;  %4503 = vmatprep.subr.mxu0 %v4838_v49 }
 0x908   :  { %2178 = vrot.lane.b32.xlu1 %v5178_v48, %s4837_s6 }
 0x90b   :  { %2180 = vrot.lane.b32.xlu0 %v5171_v53, %s4837_s6 }
 0x97e   :  { %v2040_v45 = vpop.xlane.xlu0 %2039 }
 0x97f   :  { %v2043_v2 = vmul.f32 0.03125, %v2040_v45 }
 0x980   :  { %v2037_v3 = vpop.xlane.xlu1 %2036 }
 0x981   :  { %v2045_v18 = vsub.f32 %v2032_v61, %v2043_v2  ;;  %v2042_v59 = vmul.f32 0.03125, %v2037_v3 }
 0x982   :  { %v2181_v4 = vpop.permute.xlu0 %2180 }
 0x983   :  { %v2044_v35 = vsub.f32 %v2031_v63, %v2042_v59  ;;  %v2047_v5 = vmul.f32 %v2045_v18, %v2045_v18  ;;  %4489 = vmatprep.subr.mxu1 %v2181_v4 }
 0x984   :  { %4490 = vmatpush3.msra.mxu1 %v2181_v4  ;;  %v2179_v6 = vpop.permute.xlu1 %2178 }
 0x985   :  { %v2051_v7 = vsel %vm173_vm1, %v2047_v5, 0.0  ;;  %v2046_v8 = vmul.f32 %v2044_v35, %v2044_v35  ;;  %4491 = vmatprep.subr.mxu1 %v2179_v6 }
 0x986   :  { %2052 = vadd.xlane.f32.xlu1 %v2051_v7  ;;  %4492 = vmatpush3.msra.mxu1 %v2179_v6 }
 0x987   :  { %v2048_v38 = vsel %vm173_vm1, %v2046_v8, 0.0 }
 0x988   :  { %2049 = vadd.xlane.f32.xlu0 %v2048_v38 }
 0x997   :  { %2176 = vrot.lane.b32.xlu1 %v5191_v1, %s4837_s6 }
 0x99b   :  { %2187 = vrot.lane.b32.xlu1 %v5211_v39, %s4837_s6 }
 0x99e   :  { %2174 = vrot.lane.b32.xlu0 %v5200_v43, %s4837_s6 }
 0xa0f   :  { %v2053_v9 = vpop.xlane.xlu1 %2052 }
 0xa10   :  { %v2055_v10 = vmul.f32 0.03125, %v2053_v9 }
 0xa11   :  { %v2050_v12 = vpop.xlane.xlu0 %2049 }
 0xa12   :  { %v2057_v13 = vadd.f32 1e-05, %v2055_v10  ;;  %v2054_v14 = vmul.f32 0.03125, %v2050_v12 }
 0xa13   :  { %v2177_v17 = vpop.permute.xlu1 %2176 }
 0xa14   :  { %4702 = vrsqrt.f32 %v2057_v13  ;;  %v2056_v20 = vadd.f32 1e-05, %v2054_v14  ;;  %4493 = vmatprep.subr.mxu1 %v2177_v17 }
 0xa15   :  { %v2175_v21 = vpop.permute.xlu0 %2174  ;;  %4494 = vmatpush3.msra.mxu1 %v2177_v17 }
 0xa16   :  { %4704 = vrsqrt.f32 %v2056_v20  ;;  %4495 = vmatprep.subr.mxu1 %v2175_v21 }
 0xa17   :  { %4496 = vmatpush3.msra.mxu1 %v2175_v21  ;;  %v5246_v33 = vpop.permute.xlu1 %2187 }
 0xa18   :  { %4498 = vmatmul.mubr.msk.f32.vlgmr.msra.gmra.mxu1 %vm173_vm1, %v2167_v22  ;;  %4510 = vmatprep.subr.mxu1 %v4838_v49 }
 0xa19   :  { %4500 = vmatprep.mubr.msk.f32.mxu1 %vm173_vm1, %v2168_v24 }
 0xa1c   :  { %4501 = vmatmul.mubr.msk.f32.gmra.mxu1 %vm173_vm1, %v2169_v50 }
 0xa1d   :  { %4514 = vmatprep.mubr.msk.f32.mxu1 %vm4839_vm2, %v4838_v49 }
 0xa21   :  { %v4703_v52 = vpop.eup %4702 }
 0xa22   :  { %v2061_v25 = vmul.f32 %v4703_v52, %v2045_v18 }
 0xa23   :  { %v4705_v26 = vpop.eup %4704 }
 0xa24   :  { %v2060_v11 = vmul.f32 %v4705_v26, %v2044_v35  ;;  %v2067_v28 = vmul.f32 %v4134_v56, %v2061_v25 }
 0xa26   :  { %v2066_v29 = vmul.f32 %v4134_v56, %v2060_v11  ;;  %v5234_v30 = vadd.f32 %v4135_v27, %v2067_v28 }
 0xa28   :  { %v5236_v31 = vadd.f32 %v4135_v27, %v2066_v29  ;;  %v2075_v32 = vadd.f32 %v5234_v30, %v4984_v42 }
 0xa2a   :  { %v2074_v55 = vadd.f32 %v5236_v31, %v4990_v46 }
 0xa2c   :  { %4486 = vmatprep.mubr.msk.f32.mxu0 %vm173_vm1, %v2074_v55 }
 0xa2d   :  { %4487 = vmatmul.mubr.msk.f32.vlgmr.msra.gmra.mxu0 %vm173_vm1, %v2075_v32 }
 0xa2e   :  { %4507 = vmatprep.mubr.msk.f32.mxu0 %vm4839_vm2, %v4838_v49 }
 0xad8   :  { %v4499_v34 = vpop.f32.mrf.mxu1 }
 0xad9   :  { %v5249_v36 = vadd.f32 %v4499_v34, %v5246_v33 }
 0xada   :  { %v2268_v37 = vpop.f32.mrf.mxu1 }
 0xadb   :  { %v5252_v40 = vadd.f32 %v2268_v37, %v5246_v33  ;;  %2370 = vrot.lane.b32.xlu0 %v5249_v36, %s4842_s21  ;;  %4504 = vmatpush3.xpose.msk.msra.mxu0 %vm80_vm0, %v5249_v36 }
 0xadc   :  { %4505 = vmatprep.subr.mxu0 %v4838_v49  ;;  %v4502_v4 = vpop.f32.mrf.mxu1 }
 0xadd   :  { %2368 = vrot.lane.b32.xlu1 %v5252_v40, %s4842_s21  ;;  %v5324_v14 = vadd.f32 %v4502_v4, %v5246_v33 }
 0xade   :  { %v2278_v35 = vpop.f32.mrf.mxu1 }
 0xadf   :  { %2452 = vrot.lane.b32.xlu0 %v5249_v36, %s4843_s22  ;;  %4506 = vmatpush3.xpose.msk.msra.mxu0 %vm80_vm0, %v5252_v40  ;;  %v5339_v32 = vadd.f32 %v2278_v35, %v5246_v33 }
 0xae0   :  { %4517 = vmatprep.subr.mxu0 %v4838_v49 }
 0xae3   :  { %2534 = vrot.lane.b32.xlu0 %v5249_v36, %s4845_s2 }
 0xae7   :  { %2532 = vrot.lane.b32.xlu0 %v5252_v40, %s4845_s2 }
 0xaed   :  { %v5270_v42 = vpop.f32.mrf.mxu0 }
 0xaef   :  { %v2157_v46 = vpop.f32.mrf.mxu0 }
 0xaf0   :  { %v2158_v41 = vadd.f32 %v5211_v39, %v2157_v46 }
 0xaf2   :  { %2530 = vrot.lane.b32.xlu0 %v2158_v41, %s4845_s2  ;;  %2366 = vrot.lane.b32.xlu1 %v2158_v41, %s4842_s21 }
 0xaf3   :  { %4508 = vmatmul.mubr.msk.f32.vlgmr.msra.gmra.mxu0 %vm80_vm0, %v2158_v41 }
 0xaf4   :  { %4521 = vmatprep.mubr.msk.f32.mxu0 %vm4839_vm2, %v4838_v49 }
 0xaf6   :  { %2658 = vrot.lane.b32.xlu0 %v5249_v36, %s4837_s6  ;;  %2450 = vrot.lane.b32.xlu1 %v5252_v40, %s4843_s22 }
 0xafa   :  { %2735 = vrot.lane.b32.xlu0 %v5252_v40, %s4840_s19  ;;  %2448 = vrot.lane.b32.xlu1 %v2158_v41, %s4843_s22 }
 0xafe   :  { %2656 = vrot.lane.b32.xlu1 %v5252_v40, %s4837_s6 }
 0xb02   :  { %2737 = vrot.lane.b32.xlu1 %v5249_v36, %s4840_s19 }
 0xb06   :  { %2816 = vrot.lane.b32.xlu1 %v5249_v36, %s4841_s20 }
 0xb4d   :  { %v2371_v44 = vpop.permute.xlu0 %2370 }
 0xb4e   :  { %4511 = vmatpush3.xpose.msk.msra.mxu1 %vm80_vm0, %v2371_v44 }
 0xb4f   :  { %4512 = vmatprep.subr.mxu1 %v4838_v49  ;;  %v2369_v47 = vpop.permute.xlu1 %2368 }
 0xb51   :  { %v2453_v51 = vpop.permute.xlu0 %2452 }
 0xb52   :  { %4513 = vmatpush3.xpose.msk.msra.mxu1 %vm80_vm0, %v2369_v47  ;;  %4518 = vmatpush3.xpose.msk.msra.mxu0 %vm80_vm0, %v2453_v51 }
 0xb53   :  { %4524 = vmatprep.subr.mxu1 %v4838_v49  ;;  %4519 = vmatprep.subr.mxu0 %v4838_v49 }
 0xb55   :  { %v2535_v54 = vpop.permute.xlu0 %2534 }
 0xb59   :  { %v2533_v57 = vpop.permute.xlu0 %2532 }
 0xb64   :  { %v2367_v58 = vpop.permute.xlu1 %2366  ;;  %v2531_v60 = vpop.permute.xlu0 %2530 }
 0xb65   :  { %4515 = vmatmul.mubr.msk.f32.vlgmr.msra.gmra.mxu1 %vm80_vm0, %v2367_v58 }
 0xb66   :  { %4525 = vmatpush3.xpose.msk.msra.mxu1 %vm80_vm0, %v2535_v54  ;;  %4528 = vmatprep.mubr.msk.f32.mxu1 %vm4839_vm2, %v4838_v49 }
 0xb67   :  { %4526 = vmatprep.subr.mxu1 %v4838_v49 }
 0xb68   :  { %v2451_v61 = vpop.permute.xlu1 %2450  ;;  %v2659_v63 = vpop.permute.xlu0 %2658 }
 0xb69   :  { %4520 = vmatpush3.xpose.msk.msra.mxu0 %vm80_vm0, %v2451_v61 }
 0xb6a   :  { %4527 = vmatpush3.xpose.msk.msra.mxu1 %vm80_vm0, %v2533_v57  ;;  %4531 = vmatprep.subr.mxu0 %v4838_v49 }
 0xb6b   :  { %4545 = vmatprep.subr.mxu1 %v4838_v49 }
 0xb6c   :  { %v2449_v62 = vpop.permute.xlu1 %2448  ;;  %v2736_v22 = vpop.permute.xlu0 %2735 }
 0xb6d   :  { %4529 = vmatmul.mubr.msk.f32.vlgmr.msra.gmra.mxu1 %vm80_vm0, %v2531_v60  ;;  %4522 = vmatmul.mubr.msk.f32.vlgmr.msra.gmra.mxu0 %vm80_vm0, %v2449_v62 }
 0xb6e   :  { %4532 = vmatpush3.msra.mxu0 %v2659_v63  ;;  %4535 = vmatprep.mubr.msk.f32.mxu0 %vm4839_vm2, %v4838_v49 }
 0xb6f   :  { %4533 = vmatprep.subr.mxu0 %v4838_v49  ;;  %4549 = vmatprep.mubr.msk.f32.mxu1 %vm4839_vm2, %v4838_v49 }
 0xb70   :  { %v2657_v0 = vpop.permute.xlu1 %2656 }
 0xb71   :  { %4534 = vmatpush3.msra.mxu0 %v2657_v0 }
 0xb72   :  { %4538 = vmatprep.subr.mxu0 %v4838_v49 }
 0xb74   :  { %v5314_v45 = vpop.permute.xlu1 %2737 }
 0xb78   :  { %v2817_v2 = vpop.permute.xlu1 %2816 }
 0xb79   :  { %4546 = vmatpush3.msra.mxu1 %v2817_v2 }
 0xb7a   :  { %4547 = vmatprep.subr.mxu1 %v4838_v49 }
 0xbb3   :  { %v2362_v3 = vpop.f32.mrf.mxu0 }
 0xbb4   :  { %v2612_v18 = vsel %vm1251_vm3, %v2362_v3, -inf }
 0xbb5   :  { %2613 = vmax.xlane.f32.xlu1 %v2612_v18  ;;  %v4509_v59 = vpop.f32.mrf.mxu0 }
 0xbc6   :  { %2814 = vrot.lane.b32.xlu1 %v5252_v40, %s4841_s20 }
 0xc25   :  { %v2444_v5 = vpop.f32.mrf.mxu1 }
 0xc26   :  { %v2615_v6 = vsel %vm1251_vm3, %v2444_v5, -inf }
 0xc27   :  { %2616 = vmax.xlane.f32.xlu0 %v2615_v6  ;;  %v4516_v7 = vpop.f32.mrf.mxu1 }
 0xc2d   :  { %v2608_v8 = vpop.f32.mrf.mxu1  ;;  %v2526_v38 = vpop.f32.mrf.mxu0 }
 0xc2e   :  { %v2621_v9 = vsel %vm1251_vm3, %v2608_v8, -inf  ;;  %v2618_v10 = vsel %vm1251_vm3, %v2526_v38, -inf }
 0xc2f   :  { %v4530_v12 = vpop.f32.mrf.mxu1  ;;  %2622 = vmax.xlane.f32.xlu1 %v2621_v9  ;;  %2619 = vmax.xlane.f32.xlu0 %v2618_v10  ;;  %v4523_v13 = vpop.f32.mrf.mxu0 }
 0xc3e   :  { %v2614_v15 = vpop.xlane.xlu1 %2613 }
 0xc3f   :  { %v2624_v17 = vsub.f32 %v2362_v3, %v2614_v15 }
 0xc40   :  { %3070 = vrot.lane.b32.xlu1 %v5324_v14, %s4842_s21 }
 0xc41   :  { %v2628_v19 = vmul.f32 1.442695, %v2624_v17 }
 0xc42   :  { %v2815_v16 = vpop.permute.xlu1 %2814 }
 0xc43   :  { %4548 = vmatpush3.msra.mxu1 %v2815_v16  ;;  %4706 = vpow2.f32 %v2628_v19 }
 0xc44   :  { %4559 = vmatprep.subr.mxu1 %v4838_v49 }
 0xc45   :  { %2895 = vrot.lane.b32.xlu0 %v5249_v36, %s4844_s23  ;;  %v2163_v36 = vadd.f32 %v5270_v42, %v5211_v39 }
 0xc50   :  { %v4707_v20 = vpop.eup %4706 }
 0xc51   :  { %v2636_v21 = vsel %vm1251_vm3, %v4707_v20, 0.0 }
 0xc64   :  { %2637 = vadd.xlane.f32.xlu0 %v2636_v21 }
 0xc7a   :  { %2893 = vrot.lane.b32.xlu0 %v5252_v40, %s4844_s23 }
 0xcb0   :  { %v2617_v23 = vpop.xlane.xlu0 %2616 }
 0xcb1   :  { %v2625_v24 = vsub.f32 %v2444_v5, %v2617_v23 }
 0xcb3   :  { %v2630_v50 = vmul.f32 1.442695, %v2625_v24 }
 0xcb5   :  { %4708 = vpow2.f32 %v2630_v50 }
 0xcb8   :  { %v2620_v52 = vpop.xlane.xlu0 %2619  ;;  %v2623_v29 = vpop.xlane.xlu1 %2622 }
 0xcb9   :  { %v2626_v56 = vsub.f32 %v2526_v38, %v2620_v52  ;;  %v2627_v55 = vsub.f32 %v2608_v8, %v2623_v29 }
 0xcbb   :  { %v2632_v25 = vmul.f32 1.442695, %v2626_v56  ;;  %v2634_v34 = vmul.f32 1.442695, %v2627_v55 }
 0xcbc   :  { %v2896_v37 = vpop.permute.xlu0 %2895  ;;  %v3071_v39 = vpop.permute.xlu1 %3070 }
 0xcbd   :  { %4710 = vpow2.f32 %v2632_v25 }
 0xcbe   :  { %4712 = vpow2.f32 %v2634_v34 }
 0xcc2   :  { %v4709_v26 = vpop.eup %4708 }
 0xcc3   :  { %v2639_v27 = vsel %vm1251_vm3, %v4709_v26, 0.0 }
 0xcc4   :  { %2640 = vadd.xlane.f32.xlu1 %v2639_v27 }
 0xcca   :  { %v4711_v11 = vpop.eup %4710 }
 0xccb   :  { %v2642_v28 = vsel %vm1251_vm3, %v4711_v11, 0.0  ;;  %v4713_v33 = vpop.eup %4712 }
 0xccc   :  { %2643 = vadd.xlane.f32.xlu0 %v2642_v28  ;;  %v2645_v46 = vsel %vm1251_vm3, %v4713_v33, 0.0 }
 0xcd5   :  { %3152 = vrot.lane.b32.xlu1 %v5324_v14, %s4843_s22 }
 0xce2   :  { %3068 = vrot.lane.b32.xlu0 %v5339_v32, %s4842_s21 }
 0xce6   :  { %3066 = vrot.lane.b32.xlu0 %v2163_v36, %s4842_s21 }
 0xcea   :  { %3150 = vrot.lane.b32.xlu0 %v5339_v32, %s4843_s22 }
 0xced   :  { %v2638_v40 = vpop.xlane.xlu0 %2637 }
 0xcee   :  { %4714 = vrcp.f32 %v2638_v40  ;;  %3148 = vrot.lane.b32.xlu0 %v2163_v36, %s4843_s22 }
 0xcf1   :  { %v2894_v47 = vpop.permute.xlu0 %2893 }
 0xcf9   :  { %2646 = vadd.xlane.f32.xlu1 %v2645_v46 }
 0xcfb   :  { %v4715_v41 = vpop.eup %4714 }
 0xcfc   :  { %v2652_v44 = vmul.f32 %v4715_v41, %v4707_v20 }
 0xcfe   :  { %4536 = vmatmul.mubr.msk.f32.vlgmr.msra.gmra.mxu0 %vm1251_vm3, %v2652_v44 }
 0xcff   :  { %4539 = vmatpush3.msra.mxu0 %v5314_v45  ;;  %4542 = vmatprep.mubr.msk.f32.mxu0 %vm4839_vm2, %v4838_v49 }
 0xd00   :  { %4540 = vmatprep.subr.mxu0 %v4838_v49 }
 0xd01   :  { %4541 = vmatpush3.msra.mxu0 %v2736_v22 }
 0xd02   :  { %4552 = vmatprep.subr.mxu0 %v4838_v49 }
 0xd0a   :  { %3234 = vrot.lane.b32.xlu1 %v5324_v14, %s4845_s2 }
 0xd0e   :  { %3232 = vrot.lane.b32.xlu1 %v5339_v32, %s4845_s2 }
 0xd12   :  { %3230 = vrot.lane.b32.xlu1 %v2163_v36, %s4845_s2 }
 0xd4d   :  { %v2641_v42 = vpop.xlane.xlu1 %2640 }
 0xd4e   :  { %4716 = vrcp.f32 %v2641_v42 }
 0xd51   :  { %v3153_v63 = vpop.permute.xlu1 %3152 }
 0xd55   :  { %v2644_v51 = vpop.xlane.xlu0 %2643 }
 0xd56   :  { %4718 = vrcp.f32 %v2644_v51 }
 0xd59   :  { %v3069_v60 = vpop.permute.xlu0 %3068 }
 0xd5b   :  { %v4717_v54 = vpop.eup %4716 }
 0xd5c   :  { %v2653_v57 = vmul.f32 %v4717_v54, %v4709_v26 }
 0xd5d   :  { %v3067_v62 = vpop.permute.xlu0 %3066 }
 0xd5e   :  { %4543 = vmatmul.mubr.msk.f32.vlgmr.msra.gmra.mxu0 %vm1251_vm3, %v2653_v57 }
 0xd5f   :  { %4553 = vmatpush3.msra.mxu0 %v2896_v37  ;;  %4556 = vmatprep.mubr.msk.f32.mxu0 %vm4839_vm2, %v4838_v49 }
 0xd60   :  { %4554 = vmatprep.subr.mxu0 %v4838_v49 }
 0xd61   :  { %4555 = vmatpush3.msra.mxu0 %v2894_v47  ;;  %v3151_v0 = vpop.permute.xlu0 %3150 }
 0xd62   :  { %4566 = vmatprep.subr.mxu0 %v4838_v49 }
 0xd63   :  { %v4719_v58 = vpop.eup %4718 }
 0xd64   :  { %v2654_v61 = vmul.f32 %v4719_v58, %v4711_v11 }
 0xd65   :  { %v3149_v45 = vpop.permute.xlu0 %3148 }
 0xd66   :  { %4550 = vmatmul.mubr.msk.f32.vlgmr.msra.gmra.mxu1 %vm1251_vm3, %v2654_v61 }
 0xd67   :  { %4560 = vmatpush3.xpose.msk.msra.mxu1 %vm80_vm0, %v5324_v14  ;;  %4563 = vmatprep.mubr.msk.f32.mxu1 %vm4839_vm2, %v4838_v49 }
 0xd68   :  { %4561 = vmatprep.subr.mxu1 %v4838_v49 }
 0xd6b   :  { %4562 = vmatpush3.xpose.msk.msra.mxu1 %vm80_vm0, %v5339_v32 }
 0xd6c   :  { %4573 = vmatprep.subr.mxu1 %v4838_v49 }
 0xd6e   :  { %4564 = vmatmul.mubr.msk.f32.vlgmr.msra.gmra.mxu1 %vm80_vm0, %v2163_v36 }
 0xd6f   :  { %4574 = vmatpush3.xpose.msk.msra.mxu1 %vm80_vm0, %v3153_v63  ;;  %4577 = vmatprep.mubr.msk.f32.mxu1 %vm4839_vm2, %v4838_v49 }
 0xd70   :  { %4575 = vmatprep.subr.mxu1 %v4838_v49 }
 0xd73   :  { %4576 = vmatpush3.xpose.msk.msra.mxu1 %vm80_vm0, %v3151_v0 }
 0xd74   :  { %4587 = vmatprep.subr.mxu1 %v4838_v49 }
 0xd76   :  { %4578 = vmatmul.mubr.msk.f32.vlgmr.msra.gmra.mxu1 %vm80_vm0, %v3149_v45 }
 0xd77   :  { %4591 = vmatprep.mubr.msk.f32.mxu1 %vm4839_vm2, %v4838_v49 }
 0xd82   :  { %v2647_v2 = vpop.xlane.xlu1 %2646 }
 0xd83   :  { %4720 = vrcp.f32 %v2647_v2 }
 0xd86   :  { %v3235_v59 = vpop.permute.xlu1 %3234 }
 0xd8a   :  { %v3233_v4 = vpop.permute.xlu1 %3232 }
 0xd8e   :  { %v3231_v35 = vpop.permute.xlu1 %3230 }
 0xd90   :  { %v4721_v3 = vpop.eup %4720 }
 0xd91   :  { %v2655_v18 = vmul.f32 %v4721_v3, %v4713_v33 }
 0xd93   :  { %4557 = vmatmul.mubr.msk.f32.vlgmr.msra.gmra.mxu0 %vm1251_vm3, %v2655_v18 }
 0xd94   :  { %4567 = vmatpush3.xpose.msk.msra.mxu0 %vm80_vm0, %v3071_v39  ;;  %4570 = vmatprep.mubr.msk.f32.mxu0 %vm4839_vm2, %v4838_v49 }
 0xd95   :  { %4568 = vmatprep.subr.mxu0 %v4838_v49 }
 0xd98   :  { %4569 = vmatpush3.xpose.msk.msra.mxu0 %vm80_vm0, %v3069_v60 }
 0xd99   :  { %4580 = vmatprep.subr.mxu0 %v4838_v49 }
 0xd9b   :  { %4571 = vmatmul.mubr.msk.f32.vlgmr.msra.gmra.mxu0 %vm80_vm0, %v3067_v62 }
 0xd9c   :  { %4581 = vmatpush3.xpose.msk.msra.mxu0 %vm80_vm0, %v3235_v59  ;;  %4584 = vmatprep.mubr.msk.f32.mxu0 %vm4839_vm2, %v4838_v49 }
 0xd9d   :  { %4582 = vmatprep.subr.mxu0 %v4838_v49 }
 0xda0   :  { %4583 = vmatpush3.xpose.msk.msra.mxu0 %vm80_vm0, %v3233_v4 }
 0xda1   :  { %4594 = vmatprep.subr.mxu0 %v4838_v49 }
 0xda3   :  { %4585 = vmatmul.mubr.msk.f32.vlgmr.msra.gmra.mxu0 %vm80_vm0, %v3231_v35 }
 0xda4   :  { %4598 = vmatprep.mubr.msk.f32.mxu0 %vm4839_vm2, %v4838_v49 }
 0xdbe   :  { %v5402_v5 = vpop.f32.mrf.mxu0 }
 0xdc0   :  { %v4537_v6 = vpop.f32.mrf.mxu0 }
 0xe1e   :  { %v5404_v7 = vpop.f32.mrf.mxu0 }
 0xe20   :  { %v4544_v8 = vpop.f32.mrf.mxu0 }
 0xe26   :  { %v5406_v38 = vpop.f32.mrf.mxu1 }
 0xe28   :  { %v4551_v9 = vpop.f32.mrf.mxu1 }
 0xe2e   :  { %v3062_v10 = vpop.f32.mrf.mxu1 }
 0xe2f   :  { %v3312_v12 = vsel %vm1251_vm3, %v3062_v10, -inf }
 0xe30   :  { %3313 = vmax.xlane.f32.xlu0 %v3312_v12  ;;  %v4565_v13 = vpop.f32.mrf.mxu1 }
 0xe36   :  { %v3226_v15 = vpop.f32.mrf.mxu1 }
 0xe37   :  { %v3318_v16 = vsel %vm1251_vm3, %v3226_v15, -inf }
 0xe38   :  { %3319 = vmax.xlane.f32.xlu0 %v3318_v16  ;;  %v4579_v17 = vpop.f32.mrf.mxu1 }
 0xe53   :  { %v2968_v19 = vpop.f32.mrf.mxu0 }
 0xe55   :  { %v4558_v20 = vpop.f32.mrf.mxu0 }
 0xe5b   :  { %v3144_v21 = vpop.f32.mrf.mxu0 }
 0xe5c   :  { %v3315_v22 = vsel %vm1251_vm3, %v3144_v21, -inf }
 0xe5d   :  { %3316 = vmax.xlane.f32.xlu1 %v3315_v22  ;;  %v4572_v23 = vpop.f32.mrf.mxu0 }
 0xe63   :  { %v3308_v24 = vpop.f32.mrf.mxu0 }
 0xe64   :  { %v3321_v50 = vsel %vm1251_vm3, %v3308_v24, -inf }
 0xe65   :  { %3322 = vmax.xlane.f32.xlu0 %v3321_v50  ;;  %v4586_v52 = vpop.f32.mrf.mxu0 }
 0xe6e   :  { %3358 = vrot.lane.b32.xlu1 %v5324_v14, %s4837_s6 }
 0xe72   :  { %3356 = vrot.lane.b32.xlu1 %v5339_v32, %s4837_s6 }
 0xe76   :  { %3435 = vrot.lane.b32.xlu1 %v5339_v32, %s4840_s19 }
 0xe7a   :  { %3595 = vrot.lane.b32.xlu1 %v5324_v14, %s4844_s23 }
 0xe7b   :  { %3437 = vrot.lane.b32.xlu0 %v5324_v14, %s4840_s19 }
 0xe7f   :  { %3516 = vrot.lane.b32.xlu0 %v5324_v14, %s4841_s20 }
 0xeb9   :  { %v3314_v56 = vpop.xlane.xlu0 %3313 }
 0xeba   :  { %v3324_v25 = vsub.f32 %v3062_v10, %v3314_v56 }
 0xebc   :  { %v3328_v26 = vmul.f32 1.442695, %v3324_v25 }
 0xebe   :  { %4722 = vpow2.f32 %v3328_v26  ;;  %v4175_v26 = vld [vmem:[#allocation7 + $0x4] ss:$0 sm:$0xff] }
 0xec1   :  { %v3320_v27 = vpop.xlane.xlu0 %3319 }
 0xec2   :  { %v3326_v11 = vsub.f32 %v3226_v15, %v3320_v27 }
 0xec4   :  { %v3332_v28 = vmul.f32 1.442695, %v3326_v11 }
 0xec6   :  { %4724 = vpow2.f32 %v3332_v28 }
 0xecb   :  { %v4723_v29 = vpop.eup %4722 }
 0xecc   :  { %v3336_v55 = vsel %vm1251_vm3, %v4723_v29, 0.0 }
 0xecd   :  { %3337 = vadd.xlane.f32.xlu1 %v3336_v55 }
 0xed3   :  { %v4725_v34 = vpop.eup %4724 }
 0xed4   :  { %v3342_v36 = vsel %vm1251_vm3, %v4725_v34, 0.0 }
 0xed5   :  { %3343 = vadd.xlane.f32.xlu1 %v3342_v36 }
 0xee6   :  { %v3317_v37 = vpop.xlane.xlu1 %3316  ;;  %3593 = vrot.lane.b32.xlu1 %v5339_v32, %s4844_s23 }
 0xee7   :  { %v3325_v14 = vsub.f32 %v3144_v21, %v3317_v37 }
 0xee9   :  { %v3330_v40 = vmul.f32 1.442695, %v3325_v14 }
 0xeea   :  { %v3359_v33 = vpop.permute.xlu1 %3358  ;;  %3696 = vrot.lane.b32.xlu1 %v5178_v48, %s4850_s28 }
 0xeeb   :  { %4726 = vpow2.f32 %v3330_v40  ;;  %4588 = vmatpush3.msra.mxu1 %v3359_v33 }
 0xeec   :  { %4589 = vmatprep.subr.mxu1 %v4838_v49 }
 0xeee   :  { %v3357_v46 = vpop.permute.xlu1 %3356  ;;  %v3323_v41 = vpop.xlane.xlu0 %3322  ;;  %3694 = vrot.lane.b32.xlu1 %v5191_v1, %s4850_s28 }
 0xeef   :  { %v3327_v44 = vsub.f32 %v3308_v24, %v3323_v41  ;;  %4590 = vmatpush3.msra.mxu1 %v3357_v46 }
 0xef0   :  { %4601 = vmatprep.subr.mxu1 %v4838_v49 }
 0xef1   :  { %v3334_v39 = vmul.f32 1.442695, %v3327_v44 }
 0xef2   :  { %v3438_v42 = vpop.permute.xlu0 %3437  ;;  %v3436_v47 = vpop.permute.xlu1 %3435 }
 0xef3   :  { %4728 = vpow2.f32 %v3334_v39  ;;  %4595 = vmatpush3.msra.mxu0 %v3438_v42 }
 0xef4   :  { %4596 = vmatprep.subr.mxu0 %v4838_v49 }
 0xef5   :  { %4597 = vmatpush3.msra.mxu0 %v3436_v47 }
 0xef6   :  { %4608 = vmatprep.subr.mxu0 %v4838_v49  ;;  %v3596_v1 = vpop.permute.xlu1 %3595 }
 0xef8   :  { %v4727_v48 = vpop.eup %4726 }
 0xef9   :  { %v3339_v51 = vsel %vm1251_vm3, %v4727_v48, 0.0 }
 0xefa   :  { %3340 = vadd.xlane.f32.xlu0 %v3339_v51  ;;  %v3828_v51 = vld [vmem:[%s5521_s4 + $0x30] sm:$0xff] }
 0xf00   :  { %v4729_v54 = vpop.eup %4728 }
 0xf01   :  { %v3345_v57 = vsel %vm1251_vm3, %v4729_v54, 0.0 }
 0xf02   :  { %3346 = vadd.xlane.f32.xlu0 %v3345_v57 }
 0xf18   :  { %3514 = vrot.lane.b32.xlu0 %v5339_v32, %s4841_s20  ;;  %v3517_v32 = vpop.permute.xlu0 %3516 }
 0xf1c   :  { %3698 = vrot.lane.b32.xlu0 %v5171_v53, %s4850_s28 }
 0xf20   :  { %2973 = vrot.lane.b32.xlu0 %v5404_v7, %s4835_s10 }
 0xf24   :  { %2977 = vrot.lane.b32.xlu0 %v5406_v38, %s4851_s29 }
 0xf28   :  { %2981 = vrot.lane.b32.xlu0 %v2968_v19, %s4852_s30 }
 0xf2c   :  { %3692 = vrot.lane.b32.xlu0 %v5200_v43, %s4850_s28 }
 0xf56   :  { %v3338_v58 = vpop.xlane.xlu1 %3337 }
 0xf57   :  { %4730 = vrcp.f32 %v3338_v58 }
 0xf5e   :  { %v3344_v53 = vpop.xlane.xlu1 %3343 }
 0xf5f   :  { %4732 = vrcp.f32 %v3344_v53 }
 0xf62   :  { %v3594_v59 = vpop.permute.xlu1 %3593 }
 0xf64   :  { %v4731_v60 = vpop.eup %4730 }
 0xf65   :  { %v3352_v61 = vmul.f32 %v4731_v60, %v4723_v29 }
 0xf66   :  { %v3697_v12 = vpop.permute.xlu1 %3696 }
 0xf67   :  { %4592 = vmatmul.mubr.msk.f32.vlgmr.msra.gmra.mxu1 %vm1251_vm3, %v3352_v61 }
 0xf68   :  { %4602 = vmatpush3.msra.mxu1 %v3517_v32  ;;  %4605 = vmatprep.mubr.msk.f32.mxu1 %vm4839_vm2, %v4838_v49 }
 0xf69   :  { %4603 = vmatprep.subr.mxu1 %v4838_v49 }
 0xf6c   :  { %v4733_v43 = vpop.eup %4732 }
 0xf6d   :  { %v3354_v45 = vmul.f32 %v4733_v43, %v4725_v34 }
 0xf83   :  { %v3341_v62 = vpop.xlane.xlu0 %3340 }
 0xf84   :  { %4734 = vrcp.f32 %v3341_v62 }
 0xf8b   :  { %v3347_v63 = vpop.xlane.xlu0 %3346 }
 0xf8c   :  { %4736 = vrcp.f32 %v3347_v63 }
 0xf8f   :  { %v3515_v0 = vpop.permute.xlu0 %3514 }
 0xf90   :  { %4604 = vmatpush3.msra.mxu1 %v3515_v0  ;;  %v4178_v0 = vld [vmem:[#allocation7 + $0x8] ss:$0 sm:$0xff] }
 0xf91   :  { %v4735_v2 = vpop.eup %4734  ;;  %4606 = vmatmul.mubr.msk.f32.vlgmr.msra.gmra.mxu1 %vm1251_vm3, %v3354_v45 }
 0xf92   :  { %v3353_v3 = vmul.f32 %v4735_v2, %v4727_v48  ;;  %v3829_v48 = vld [vmem:[%s5521_s4 + $0x50] sm:$0xff]  ;;  %v4179_v2 = vld [vmem:[#allocation7 + $0x9] ss:$0 sm:$0xff] }
 0xf93   :  { %v3699_v18 = vpop.permute.xlu0 %3698 }
 0xf94   :  { %4599 = vmatmul.mubr.msk.f32.vlgmr.msra.gmra.mxu0 %vm1251_vm3, %v3353_v3  ;;  %4615 = vmatprep.subr.mxu1 %v3699_v18 }
 0xf95   :  { %4609 = vmatpush3.msra.mxu0 %v3596_v1  ;;  %4612 = vmatprep.mubr.msk.f32.mxu0 %vm4839_vm2, %v4838_v49 }
 0xf96   :  { %4610 = vmatprep.subr.mxu0 %v4838_v49  ;;  %4616 = vmatpush3.msra.mxu1 %v3699_v18  ;;  %v3695_v49 = vpop.permute.xlu1 %3694 }
 0xf97   :  { %4611 = vmatpush3.msra.mxu0 %v3594_v59  ;;  %v2974_v4 = vpop.permute.xlu0 %2973  ;;  %4617 = vmatprep.subr.mxu1 %v3697_v12 }
 0xf98   :  { %v2984_v8 = vsel %vm80_vm0, %v5402_v5, %v2974_v4  ;;  %4618 = vmatpush3.msra.mxu1 %v3697_v12 }
 0xf99   :  { %v4737_v35 = vpop.eup %4736  ;;  %4619 = vmatprep.subr.mxu1 %v3695_v49 }
 0xf9a   :  { %v3355_v6 = vmul.f32 %v4737_v35, %v4729_v54  ;;  %4620 = vmatpush3.msra.mxu1 %v3695_v49  ;;  %v3827_v54 = vld [vmem:[%s5521_s4 + $0x10] sm:$0xff] }
 0xf9b   :  { %v2978_v7 = vpop.permute.xlu0 %2977 }
 0xf9c   :  { %4613 = vmatmul.mubr.msk.f32.vlgmr.msra.gmra.mxu0 %vm1251_vm3, %v3355_v6  ;;  %v2985_v38 = vsel %vm1251_vm3, %v2984_v8, %v2978_v7  ;;  %v4180_v8 = vld [vmem:[#allocation7 + $0x2] ss:$0 sm:$0xff] }
 0xf9f   :  { %v2982_v9 = vpop.permute.xlu0 %2981 }
 0xfa0   :  { %v2986_v10 = vsel %vm1253_vm4, %v2985_v38, %v2982_v9 }
 0xfa1   :  { %4623 = vmatprep.mubr.msk.f32.mxu1 %vm173_vm1, %v2986_v10 }
 0xfa3   :  { %v3693_v16 = vpop.permute.xlu0 %3692 }
 0xfa4   :  { %4621 = vmatprep.subr.mxu1 %v3693_v16 }
 0xfa5   :  { %4622 = vmatpush3.msra.mxu1 %v3693_v16 }
0x1027   :  { %v3431_v13 = vpop.f32.mrf.mxu1 }
0x1029   :  { %v4593_v15 = vpop.f32.mrf.mxu1 }
0x102a   :  { %v4183_v15 = vld [vmem:[#allocation7 + $0x5] ss:$0 sm:$0xff] }
0x1051   :  { %v3589_v17 = vpop.f32.mrf.mxu1 }
0x1053   :  { %v4607_v5 = vpop.f32.mrf.mxu1 }
0x1054   :  { %v3510_v19 = vpop.f32.mrf.mxu0 }
0x1055   :  { %3673 = vrot.lane.b32.xlu1 %v3510_v19, %s4835_s10 }
0x1056   :  { %v4600_v20 = vpop.f32.mrf.mxu0 }
0x1059   :  { %3677 = vrot.lane.b32.xlu1 %v3589_v17, %s4851_s29 }
0x105c   :  { %v3668_v21 = vpop.f32.mrf.mxu0 }
0x105d   :  { %3681 = vrot.lane.b32.xlu1 %v3668_v21, %s4852_s30 }
0x105e   :  { %v4614_v22 = vpop.f32.mrf.mxu0 }
0x10c7   :  { %v3674_v23 = vpop.permute.xlu1 %3673 }
0x10c8   :  { %v3684_v50 = vsel %vm80_vm0, %v3431_v13, %v3674_v23 }
0x10cb   :  { %v3678_v24 = vpop.permute.xlu1 %3677 }
0x10cc   :  { %v3685_v52 = vsel %vm1251_vm3, %v3684_v50, %v3678_v24 }
0x10cf   :  { %v3682_v56 = vpop.permute.xlu1 %3681 }
0x10d0   :  { %v3686_v25 = vsel %vm1253_vm4, %v3685_v52, %v3682_v56 }
0x10d1   :  { %4624 = vmatmul.mubr.msk.f32.vlgmr.msra.gmra.mxu1 %vm173_vm1, %v3686_v25 }
0x1191   :  { %v4625_v27 = vpop.f32.mrf.mxu1 }
0x1192   :  { %v3782_v11 = vadd.f32 %v4625_v27, %v4175_v26 }
0x1193   :  { %v3776_v28 = vpop.f32.mrf.mxu1 }
0x1194   :  { %v3786_v29 = vadd.f32 %v3782_v11, %v5234_v30  ;;  %v3777_v55 = vadd.f32 %v4175_v26, %v3776_v28 }
0x1196   :  { %v3785_v34 = vadd.f32 %v3777_v55, %v5236_v31  ;;  %v3792_v36 = vsel %vm173_vm1, %v3786_v29, 0.0  ;;  %v3830_v31 = vld [vmem:[%s5521_s4 + $0x70] sm:$0xff]  ;;  %s4853_s4 = smov [#allocation8]  }
0x1197   :  { %3793 = vadd.xlane.f32.xlu1 %v3792_v36  ;;  %4626 = vmatprep.subr.mxu0 %v3830_v31 }
0x1198   :  { %v3789_v37 = vsel %vm173_vm1, %v3785_v34, 0.0  ;;  %4627 = vmatpush3.msra.mxu0 %v3830_v31 }
0x1199   :  { %3790 = vadd.xlane.f32.xlu0 %v3789_v37  ;;  %4628 = vmatprep.subr.mxu0 %v3829_v48 }
0x119a   :  { %4629 = vmatpush3.msra.mxu0 %v3829_v48 }
0x119b   :  { %4630 = vmatprep.subr.mxu0 %v3828_v51 }
0x119c   :  { %4631 = vmatpush3.msra.mxu0 %v3828_v51 }
0x119d   :  { %4632 = vmatprep.subr.mxu0 %v3827_v54 }
0x119e   :  { %4633 = vmatpush3.msra.mxu0 %v3827_v54 }
0x11a8   :  { %3934 = vrot.lane.b32.xlu1 %v3830_v31, %s4846_s24 }
0x11ac   :  { %3930 = vrot.lane.b32.xlu1 %v3828_v51, %s4846_s24 }
0x11b0   :  { %3928 = vrot.lane.b32.xlu1 %v3827_v54, %s4846_s24 }
0x1220   :  { %v3794_v14 = vpop.xlane.xlu1 %3793 }
0x1221   :  { %v3796_v40 = vmul.f32 0.03125, %v3794_v14 }
0x1222   :  { %v3791_v33 = vpop.xlane.xlu0 %3790 }
0x1223   :  { %v3795_v46 = vmul.f32 0.03125, %v3791_v33  ;;  %v3798_v41 = vsub.f32 %v3786_v29, %v3796_v40 }
0x1224   :  { %v3935_v57 = vpop.permute.xlu1 %3934 }
0x1225   :  { %v3797_v44 = vsub.f32 %v3785_v34, %v3795_v46  ;;  %v3800_v47 = vmul.f32 %v3798_v41, %v3798_v41  ;;  %4637 = vmatprep.subr.msk.mxu1 %vm3936_vm5, %v3935_v57  ;;  %v4190_v46 = vld [vmem:[#allocation7 + $0xa] ss:$0 sm:$0xff] }
0x1226   :  { %4638 = vmatpush3.xpose.msk.msra.mxu1 %vm3936_vm5, %v3935_v57 }
0x1227   :  { %v3799_v39 = vmul.f32 %v3797_v44, %v3797_v44  ;;  %v3804_v30 = vsel %vm173_vm1, %v3800_v47, 0.0 }
0x1228   :  { %v3931_v63 = vpop.permute.xlu1 %3930 }
0x1229   :  { %v3801_v42 = vsel %vm173_vm1, %v3799_v39, 0.0 }
0x122a   :  { %3802 = vadd.xlane.f32.xlu0 %v3801_v42 }
0x122c   :  { %v3929_v7 = vpop.permute.xlu1 %3928 }
0x122e   :  { %3805 = vadd.xlane.f32.xlu0 %v3804_v30 }
0x1244   :  { %3932 = vrot.lane.b32.xlu0 %v3829_v48, %s4846_s24  ;;  %s4075_s24 = sshll.u32 %s4853_s4, 4  ;;  %s4076_s24 = int_to_ptr.vmem [resolvable:$true] %s4075_s24 }
0x1245   :  { %s4806_s28 = scalar_lea.vmem %s4076_s24, 256  ;;  %p4811_p2 = scmp.lt.s32.totalorder %s4076_s24, %s4076_s24 }
0x1246   :  { %p4807_p1 = scmp.ne.s32.totalorder %s4076_s24, %s4806_s28  ;;  %p4812_p3 = scmp.lt.s32.totalorder %s4806_s28, %s4806_s28 }
0x1248   :  { %p4813_p4 = por %p4812_p3, %p4811_p2 }
0x124a   :  { %p4814_p5 = pnand %p4813_p4, %p4807_p1 }
0x12b3   :  { %v3803_v1 = vpop.xlane.xlu0 %3802 }
0x12b4   :  { %v3807_v58 = vmul.f32 0.03125, %v3803_v1 }
0x12b6   :  { %v3809_v60 = vadd.f32 1e-05, %v3807_v58 }
0x12b7   :  { %v3806_v61 = vpop.xlane.xlu0 %3805 }
0x12b8   :  { %4738 = vrsqrt.f32 %v3809_v60  ;;  %v3808_v32 = vmul.f32 0.03125, %v3806_v61 }
0x12ba   :  { %v3810_v53 = vadd.f32 1e-05, %v3808_v32 }
0x12bb   :  { %v3933_v62 = vpop.permute.xlu0 %3932 }
0x12bc   :  { %4740 = vrsqrt.f32 %v3810_v53  ;;  %4639 = vmatprep.subr.msk.mxu1 %vm3936_vm5, %v3933_v62 }
0x12bd   :  { %4640 = vmatpush3.xpose.msk.msra.mxu1 %vm3936_vm5, %v3933_v62 }
0x12be   :  { %4641 = vmatprep.subr.msk.mxu1 %vm3936_vm5, %v3931_v63 }
0x12c1   :  { %4642 = vmatpush3.xpose.msk.msra.mxu1 %vm3936_vm5, %v3931_v63 }
0x12c2   :  { %4643 = vmatprep.subr.msk.mxu1 %vm3936_vm5, %v3929_v7 }
0x12c5   :  { %v4739_v43 = vpop.eup %4738  ;;  %4644 = vmatpush3.xpose.msk.msra.mxu1 %vm3936_vm5, %v3929_v7 }
0x12c6   :  { %v3813_v45 = vmul.f32 %v4739_v43, %v3797_v44  ;;  %v4191_v44 = vld [vmem:[#allocation7 + $0xb] ss:$0 sm:$0xff] }
0x12c8   :  { %v3819_v3 = vmul.f32 %v4178_v0, %v3813_v45 }
0x12c9   :  { %v4741_v18 = vpop.eup %4740 }
0x12ca   :  { %v3814_v59 = vmul.f32 %v4741_v18, %v3798_v41  ;;  %v3825_v4 = vadd.f32 %v4179_v2, %v3819_v3 }
0x12cc   :  { %v3820_v35 = vmul.f32 %v4178_v0, %v3814_v59  ;;  %4634 = vmatprep.mubr.msk.f32.mxu0 %vm173_vm1, %v3825_v4 }
0x12ce   :  { %v3826_v6 = vadd.f32 %v4179_v2, %v3820_v35 }
0x12d0   :  { %4635 = vmatmul.mubr.msk.f32.vlgmr.msra.gmra.mxu0 %vm173_vm1, %v3826_v6 }
0x1390   :  { %v4636_v38 = vpop.f32.mrf.mxu0 }
0x1391   :  { %v3914_v9 = vadd.f32 %v4636_v38, %v4180_v8 }
0x1392   :  { %v3908_v10 = vpop.f32.mrf.mxu0 }
0x1393   :  { %v3909_v12 = vadd.f32 %v4180_v8, %v3908_v10  ;;  %v3918_v13 = vmax.f32 %v3914_v9, 0.0 }
0x1395   :  { %v3917_v49 = vmax.f32 %v3909_v12, 0.0 }
0x1397   :  { %4645 = vmatprep.mubr.msk.f32.mxu1 %vm3936_vm5, %v3917_v49 }
0x1398   :  { %4646 = vmatmul.mubr.msk.f32.vlgmr.msra.gmra.mxu1 %vm3936_vm5, %v3918_v13 }
0x1458   :  { %v4647_v16 = vpop.f32.mrf.mxu1 }
0x1459   :  { %v4023_v17 = vadd.f32 %v4647_v16, %v4183_v15 }
0x145a   :  { %v4017_v5 = vpop.f32.mrf.mxu1 }
0x145b   :  { %v4027_v19 = vadd.f32 %v4023_v17, %v3826_v6  ;;  %v4018_v20 = vadd.f32 %v4183_v15, %v4017_v5 }
0x145d   :  { %v4026_v21 = vadd.f32 %v4018_v20, %v3825_v4  ;;  %v4033_v22 = vsel %vm173_vm1, %v4027_v19, 0.0 }
0x145e   :  { %4034 = vadd.xlane.f32.xlu1 %v4033_v22 }
0x145f   :  { %v4030_v23 = vsel %vm173_vm1, %v4026_v21, 0.0 }
0x1460   :  { %4031 = vadd.xlane.f32.xlu0 %v4030_v23 }
0x14e7   :  { %v4035_v24 = vpop.xlane.xlu1 %4034 }
0x14e8   :  { %v4037_v50 = vmul.f32 0.03125, %v4035_v24 }
0x14e9   :  { %v4032_v52 = vpop.xlane.xlu0 %4031 }
0x14ea   :  { %v4036_v56 = vmul.f32 0.03125, %v4032_v52  ;;  %v4039_v25 = vsub.f32 %v4027_v19, %v4037_v50 }
0x14ec   :  { %v4038_v26 = vsub.f32 %v4026_v21, %v4036_v56  ;;  %v4041_v28 = vmul.f32 %v4039_v25, %v4039_v25 }
0x14ee   :  { %v4040_v27 = vmul.f32 %v4038_v26, %v4038_v26  ;;  %v4045_v29 = vsel %vm173_vm1, %v4041_v28, 0.0 }
0x14f0   :  { %v4042_v11 = vsel %vm173_vm1, %v4040_v27, 0.0 }
0x14f1   :  { %4043 = vadd.xlane.f32.xlu0 %v4042_v11 }
0x14f5   :  { %4046 = vadd.xlane.f32.xlu0 %v4045_v29 }
0x157a   :  { %v4044_v55 = vpop.xlane.xlu0 %4043 }
0x157b   :  { %v4048_v34 = vmul.f32 0.03125, %v4044_v55 }
0x157d   :  { %v4050_v36 = vadd.f32 1e-05, %v4048_v34 }
0x157e   :  { %v4047_v37 = vpop.xlane.xlu0 %4046 }
0x157f   :  { %4742 = vrsqrt.f32 %v4050_v36  ;;  %v4049_v14 = vmul.f32 0.03125, %v4047_v37 }
0x1581   :  { %v4051_v40 = vadd.f32 1e-05, %v4049_v14 }
0x1583   :  { %4744 = vrsqrt.f32 %v4051_v40 }
0x158c   :  { %v4743_v33 = vpop.eup %4742 }
0x158d   :  { %v4054_v41 = vmul.f32 %v4743_v33, %v4038_v26 }
0x158f   :  { %v4060_v39 = vmul.f32 %v4190_v46, %v4054_v41 }
0x1590   :  { %v4745_v42 = vpop.eup %4744 }
0x1591   :  { %v4055_v47 = vmul.f32 %v4745_v42, %v4039_v25  ;;  %v4066_v30 = vadd.f32 %v4191_v44, %v4060_v39 }
0x1593   :  { %v4061_v31 = vmul.f32 %v4190_v46, %v4055_v47  ;;  %4068 = vst.msk [vmem:[#allocation8] sm:$0xff] %vm173_vm1, %v4066_v30 }
0x1595   :  { %v4067_v48 = vadd.f32 %v4191_v44, %v4061_v31 }
0x1597   :  { %4069 = vst.msk [vmem:[#allocation8 + $0x8] sm:$0xff] %vm173_vm1, %v4067_v48 }
0x1598   :  { %4817 = shalt.err (!%p4814_p5)
}
0x1599   :  { %4081 = dma.vmem_to_hbm [thread:$0]  %s4076_s24, 256, %s5524_s7, [#allocation4], %s4834_s9, %s4834_s9, %s4835_s10  }
0x159a   :  { %4830 = dma.done.wait [#allocation4], 256  }
0x159b   :  { %4831 = vsyncadd [#allocation4], 4294967040 }
0x159c   :  { %4085 = vsyncpa [#allocation3], 1 }
0x159d   :  { %4086 = vsyncpa [#allocation6], 1 }
0x159e   :  { %4087 = vsyncpa [#allocation4], 1 }

</bundles_post_ra>
